<compile_context>
chip_gen: v6e
topology: v6e:2x2x1
jax: 0.10.0
libtpu: 0.0.40
codegen_flags: <defaults>
</compile_context>

<pallas_src>
import functools

import jax
import jax.numpy as jnp
from jax import lax
from jax.experimental import pallas as pl
from jax.experimental.pallas import tpu as pltpu

_LANE = 128

# jnp.bfloat16 => ~3x fewer MXU passes per dot (keep elementwise math in f32);
# kept f32 by default for tight parity with the f32 PyTorch forward.
MATMUL_DTYPE = jnp.float32


def _round_up(n, m):
    return ((n + m - 1) // m) * m


# ----------------------------------------------------------------------------
# Fused Pallas kernel: 2-layer LSTM over the full sequence + final Linear.
# ----------------------------------------------------------------------------
def fused_lstm_fc_kernel(x_ref, w1ih_ref, w1hh_ref, b1_ref,
                         w2a_ref, w2b_ref, b2_ref, wfc_ref, bfc_ref, out_ref):
    """One batch tile of the whole model.

    x_ref    : (T, TILE_B, D)  time-major input tile
    w1ih_ref : (D, G)   layer-1 W_ih^T, gates packed [i|f|g|o], i/f/o cols *0.5
    w1hh_ref : (H, G)   layer-1 W_hh^T, same packing / scaling
    b1_ref   : (1, G)   layer-1 b_ih + b_hh, same scaling
    w2a_ref  : (H, G)   layer-2 W_ih^T  (applied to h1_t)
    w2b_ref  : (H, G)   layer-2 W_hh^T  (applied to h2_{t-1})
    b2_ref   : (1, G)   layer-2 b_ih + b_hh
    wfc_ref  : (H, Op)  FC weight^T (output cols zero-padded to a lane multiple)
    bfc_ref  : (1, Op)  FC bias (padded)
    out_ref  : (TILE_B, Op)  lane-dense FC output for this batch tile
    """
    T, tile_b, D = x_ref.shape
    H, G = w1hh_ref.shape                 # G == 4*H (== 128 lanes for H == 32)
    mm_dtype = w1hh_ref.dtype             # MXU operand dtype (f32 or bf16)

    # ---- Hoisted layer-1 input projection: one big MXU matmul over all T ----
    # Time-major layout, so the per-step read gx1[t] is a contiguous slab.
    x2d = x_ref[...].reshape(T * tile_b, D).astype(mm_dtype)
    gx1 = jnp.dot(x2d, w1ih_ref[...], preferred_element_type=jnp.float32)
    gx1 = (gx1 + b1_ref[...]).reshape(T, tile_b, G)     # bias folded once

    # Hoist weight loads and the b2 broadcast out of the recurrence.
    w1hh = w1hh_ref[...]
    w2a = w2a_ref[...]
    w2b = w2b_ref[...]
    b2 = jnp.broadcast_to(b2_ref[...], (tile_b, G))

    def lstm_cell(gates, c):
        # Single-tanh activation: i/f/o columns were pre-scaled by 0.5 in the
        # weights/biases, so sigmoid(z) = 0.5*(1 + tanh(z/2)) = 0.5*(1 + t).
        t = jnp.tanh(gates)                     # one 128-lane EUP op
        i_g = 0.5 * (1.0 + t[:, 0 * H:1 * H])
        f_g = 0.5 * (1.0 + t[:, 1 * H:2 * H])
        g_g = t[:, 2 * H:3 * H]                 # tanh gate: unscaled column
        o_g = 0.5 * (1.0 + t[:, 3 * H:4 * H])
        c_new = f_g * c + i_g * g_g
        h_new = o_g * jnp.tanh(c_new)
        return h_new, c_new

    def step(t, carry):
        h1, c1, h2, c2 = carry
        gx_t = gx1[t] if isinstance(t, int) else lax.dynamic_index_in_dim(
            gx1, t, axis=0, keepdims=False)
        # Layer 1: only the recurrent dot sits on the serial chain.
        g1 = gx_t + jnp.dot(h1.astype(mm_dtype), w1hh,
                            preferred_element_type=jnp.float32)
        h1, c1 = lstm_cell(g1, c1)
        # Layer 2 (wavefront): two dots instead of a per-step concat.
        g2 = (jnp.dot(h1.astype(mm_dtype), w2a, preferred_element_type=jnp.float32)
              + jnp.dot(h2.astype(mm_dtype), w2b, preferred_element_type=jnp.float32)
              + b2)
        h2, c2 = lstm_cell(g2, c2)
        # Eval-mode forward: inter-layer LSTM dropout / nn.Dropout are identity.
        return h1, c1, h2, c2

    zeros = jnp.zeros((tile_b, H), jnp.float32)
    carry = (zeros, zeros, zeros, zeros)
    if T <= 16:
        # Static unroll: cross-timestep MXU/EUP overlap for short sequences.
        for t in range(T):
            carry = step(t, carry)
    else:
        # Bounded vreg live ranges / compile time for long sequences.
        carry = lax.fori_loop(0, T, step, carry, unroll=4)
    _, _, h2, _ = carry

    # Fused final Linear on the last timestep's layer-2 hidden state.
    out_ref[...] = (jnp.dot(h2.astype(mm_dtype), wfc_ref[...],
                            preferred_element_type=jnp.float32) + bfc_ref[...])


# ----------------------------------------------------------------------------
# Wrapper
# ----------------------------------------------------------------------------
def _choose_tiling(B):
    """Pad B to a multiple of 8 and pick a power-of-two batch tile (<= 256).

    Once the (padded) batch is >= 16, the tile is capped at half of it so the
    grid has >= 2 programs and dimension_semantics=("parallel",) can shard the
    batch across v7x's two TensorCores.
    """
    bp8 = _round_up(max(B, 8), 8)
    if bp8 <= 8:
        return bp8, bp8
    max_tile = min(256, bp8 // 2)
    tile = 8
    while tile * 2 <= max_tile:
        tile *= 2
    return _round_up(bp8, tile), tile


@functools.partial(jax.jit, static_argnames=("output_dim",))
def lstm_temporal_model(x, kparams, output_dim):
    """x: (B, T, D) float32, batch-first -- same contract as the PyTorch module."""
    B, T, D = x.shape
    H, G = kparams["w1_hh"].shape
    Op = kparams["w_fc"].shape[1]

    Bp, tile_b = _choose_tiling(B)
    grid = (Bp // tile_b,)

    # Time-major feed so the hoisted projection inside the kernel is read as
    # contiguous per-step slabs; the transpose/pad is one cheap XLA pass.
    x_tm = jnp.transpose(x, (1, 0, 2)).astype(jnp.float32)
    if Bp != B:
        x_tm = jnp.pad(x_tm, ((0, 0), (0, Bp - B), (0, 0)))
    # TODO(synk): if the lane-sparse (D=16) x tile ever becomes the VMEM
    # limiter, feed x flattened to (B, T*D) and reshape in-kernel when
    # T*D % 128 == 0.

    const2 = lambda b: (0, 0)
    out_p = pl.pallas_call(
        fused_lstm_fc_kernel,
        out_shape=jax.ShapeDtypeStruct((Bp, Op), jnp.float32),
        grid=grid,
        in_specs=[
            pl.BlockSpec((T, tile_b, D), lambda b: (0, b, 0)),
            pl.BlockSpec((D, G), const2),
            pl.BlockSpec((H, G), const2),
            pl.BlockSpec((1, G), const2),
            pl.BlockSpec((H, G), const2),
            pl.BlockSpec((H, G), const2),
            pl.BlockSpec((1, G), const2),
            pl.BlockSpec((H, Op), const2),
            pl.BlockSpec((1, Op), const2),
        ],
        out_specs=pl.BlockSpec((tile_b, Op), lambda b: (b, 0)),
        compiler_params=pltpu.CompilerParams(
            dimension_semantics=("parallel",),
            vmem_limit_bytes=32 * 1024 * 1024),
    )(x_tm, kparams["w1_ih"], kparams["w1_hh"], kparams["b1"],
      kparams["w2a"], kparams["w2b"], kparams["b2"],
      kparams["w_fc"], kparams["b_fc"])
    return out_p[:B, :output_dim]     # strip batch / lane padding


# ----------------------------------------------------------------------------
# Parameters (PyTorch layout) + conversion to the packed kernel layout
# ----------------------------------------------------------------------------
def init_params(key, input_dim, hidden_dim, output_dim, num_layers=2):
    """PyTorch-style U(-1/sqrt(H), 1/sqrt(H)) init, PyTorch weight layout."""
    # TODO(synk): the fused kernel is specialized to num_layers=2 (the module's
    # default); other depths would need stacked per-layer weights.
    assert num_layers == 2, "fused kernel is specialized to num_layers=2"
    bound = hidden_dim ** -0.5
    layers = []
    for layer in range(num_layers):
        in_dim = input_dim if layer == 0 else hidden_dim
        key, k1, k2, k3, k4 = jax.random.split(key, 5)
        w_ih = jax.random.uniform(k1, (4 * hidden_dim, in_dim), jnp.float32, -bound, bound)
        w_hh = jax.random.uniform(k2, (4 * hidden_dim, hidden_dim), jnp.float32, -bound, bound)
        b_ih = jax.random.uniform(k3, (4 * hidden_dim,), jnp.float32, -bound, bound)
        b_hh = jax.random.uniform(k4, (4 * hidden_dim,), jnp.float32, -bound, bound)
        layers.append((w_ih, w_hh, b_ih, b_hh))
    key, k5, k6 = jax.random.split(key, 3)
    w_fc = jax.random.uniform(k5, (output_dim, hidden_dim), jnp.float32, -bound, bound)
    b_fc = jax.random.uniform(k6, (output_dim,), jnp.float32, -bound, bound)
    return {"lstm": layers, "w_fc": w_fc, "b_fc": b_fc}


def prepare_kernel_params(params, hidden_dim, output_dim, matmul_dtype=MATMUL_DTYPE):
    """Transpose / pack PyTorch-layout params into the lane-dense kernel layout.

    Gates keep PyTorch order [i|f|g|o] packed into the natural 4*H lanes; the
    i/f/o columns of every weight AND bias are pre-scaled by 0.5 so the kernel
    evaluates all gate nonlinearities with a single tanh per cell.
    """
    H = hidden_dim
    Op = _round_up(output_dim, _LANE)

    col_scale = jnp.concatenate([
        jnp.full((H,), 0.5, jnp.float32),     # i
        jnp.full((H,), 0.5, jnp.float32),     # f
        jnp.ones((H,), jnp.float32),          # g (tanh gate: unscaled)
        jnp.full((H,), 0.5, jnp.float32),     # o
    ])

    def pack_w(w):       # PyTorch (4H, in) -> (in, 4H), scaled, matmul dtype
        return (w.T * col_scale[None, :]).astype(matmul_dtype)

    def pack_b(b_ih, b_hh):                   # biases stay f32
        return ((b_ih + b_hh) * col_scale)[None, :].astype(jnp.float32)

    (w_ih1, w_hh1, b_ih1, b_hh1), (w_ih2, w_hh2, b_ih2, b_hh2) = params["lstm"]

    w_fc = (jnp.zeros((H, Op), jnp.float32)
            .at[:, :output_dim].set(params["w_fc"].T)).astype(matmul_dtype)
    b_fc = jnp.zeros((1, Op), jnp.float32).at[0, :output_dim].set(params["b_fc"])

    return {"w1_ih": pack_w(w_ih1), "w1_hh": pack_w(w_hh1), "b1": pack_b(b_ih1, b_hh1),
            "w2a": pack_w(w_ih2), "w2b": pack_w(w_hh2), "b2": pack_b(b_ih2, b_hh2),
            "w_fc": w_fc, "b_fc": b_fc}


# ----------------------------------------------------------------------------
# Pure-JAX reference (eval-mode PyTorch semantics) for a correctness check
# ----------------------------------------------------------------------------
def reference_model(x, params, hidden_dim):
    H = hidden_dim

    def run_layer(seq, w_ih, w_hh, b_ih, b_hh):
        B, T, _ = seq.shape
        h = jnp.zeros((B, H), jnp.float32)
        c = jnp.zeros((B, H), jnp.float32)
        outs = []
        for t in range(T):
            g = seq[:, t, :] @ w_ih.T + h @ w_hh.T + b_ih + b_hh
            i_g = jax.nn.sigmoid(g[:, :H])
            f_g = jax.nn.sigmoid(g[:, H:2 * H])
            g_g = jnp.tanh(g[:, 2 * H:3 * H])
            o_g = jax.nn.sigmoid(g[:, 3 * H:])
            c = f_g * c + i_g * g_g
            h = o_g * jnp.tanh(c)
            outs.append(h)
        return jnp.stack(outs, axis=1)

    seq = x
    for (w_ih, w_hh, b_ih, b_hh) in params["lstm"]:
        seq = run_layer(seq, w_ih, w_hh, b_ih, b_hh)
    return seq[:, -1, :] @ params["w_fc"].T + params["b_fc"]


# ----------------------------------------------------------------------------
if __name__ == "__main__":
    B, T = 2, 8
    input_dim, hidden_dim, output_dim, num_layers = 16, 32, 4, 2

    key = jax.random.PRNGKey(0)
    key, xk = jax.random.split(key)
    x = jax.random.normal(xk, (B, T, input_dim), jnp.float32)

    params = init_params(key, input_dim, hidden_dim, output_dim, num_layers)
    kparams = prepare_kernel_params(params, hidden_dim, output_dim)

    out = lstm_temporal_model(x, kparams, output_dim)
    out = jax.block_until_ready(out)

    ref = reference_model(x, params, hidden_dim)
    assert out.shape == (B, output_dim), out.shape
    tol = 5e-4 if MATMUL_DTYPE == jnp.float32 else 3e-2
    assert jnp.allclose(out, ref, atol=tol, rtol=tol), ("mismatch", out, ref)

    print("KERNEL_OK")
</pallas_src>

<mosaic_0001>
module attributes {stable_mosaic.version = 11 : i64} {
  func.func @fused_lstm_fc_kernel(%arg0: i32, %arg1: memref<8x8x16xf32, #tpu.memory_space<vmem>>, %arg2: memref<16x128xf32, #tpu.memory_space<vmem>>, %arg3: memref<32x128xf32, #tpu.memory_space<vmem>>, %arg4: memref<1x128xf32, #tpu.memory_space<vmem>>, %arg5: memref<32x128xf32, #tpu.memory_space<vmem>>, %arg6: memref<32x128xf32, #tpu.memory_space<vmem>>, %arg7: memref<1x128xf32, #tpu.memory_space<vmem>>, %arg8: memref<32x128xf32, #tpu.memory_space<vmem>>, %arg9: memref<1x128xf32, #tpu.memory_space<vmem>>, %arg10: memref<8x128xf32, #tpu.memory_space<vmem>>) attributes {dimension_semantics = [#tpu.dimension_semantics<parallel>], iteration_bounds = array<i64: 1>, scalar_prefetch = 0 : i64, scratch_operands = 0 : i64, tpu.core_type = #tpu.core_type<tc>, window_params = [{transform_indices = @transform_0, window_bounds = array<i64: 8, 8, 16>}, {pipeline_mode = #tpu.pipeline_mode<synchronous>, transform_indices = @transform_1, window_bounds = array<i64: 16, 128>}, {pipeline_mode = #tpu.pipeline_mode<synchronous>, transform_indices = @transform_2, window_bounds = array<i64: 32, 128>}, {pipeline_mode = #tpu.pipeline_mode<synchronous>, transform_indices = @transform_3, window_bounds = array<i64: 1, 128>}, {pipeline_mode = #tpu.pipeline_mode<synchronous>, transform_indices = @transform_4, window_bounds = array<i64: 32, 128>}, {pipeline_mode = #tpu.pipeline_mode<synchronous>, transform_indices = @transform_5, window_bounds = array<i64: 32, 128>}, {pipeline_mode = #tpu.pipeline_mode<synchronous>, transform_indices = @transform_6, window_bounds = array<i64: 1, 128>}, {pipeline_mode = #tpu.pipeline_mode<synchronous>, transform_indices = @transform_7, window_bounds = array<i64: 32, 128>}, {pipeline_mode = #tpu.pipeline_mode<synchronous>, transform_indices = @transform_8, window_bounds = array<i64: 1, 128>}, {transform_indices = @transform_9, window_bounds = array<i64: 8, 128>}]} {
    %c0 = arith.constant 0 : index
    %c0_0 = arith.constant 0 : index
    %c0_1 = arith.constant 0 : index
    %0 = vector.load %arg1[%c0, %c0_0, %c0_1] : memref<8x8x16xf32, #tpu.memory_space<vmem>>, vector<8x8x16xf32>
    %1 = vector.shape_cast %0 : vector<8x8x16xf32> to vector<64x16xf32>
    %c0_2 = arith.constant 0 : index
    %c0_3 = arith.constant 0 : index
    %2 = vector.load %arg2[%c0_2, %c0_3] : memref<16x128xf32, #tpu.memory_space<vmem>>, vector<16x128xf32>
    %cst = arith.constant dense<0.000000e+00> : vector<64x128xf32>
    %3 = tpu.matmul %1, %2, %cst {dimension_numbers = #tpu.dot_dimension_numbers<[1], [0], [0], [1], [0, 0, 1, 1], [], []>} : vector<64x16xf32>, vector<16x128xf32>, vector<64x128xf32> -> vector<64x128xf32>
    %c0_4 = arith.constant 0 : index
    %c0_5 = arith.constant 0 : index
    %4 = vector.load %arg4[%c0_4, %c0_5] : memref<1x128xf32, #tpu.memory_space<vmem>>, vector<1x128xf32>
    %5 = vector.broadcast %4 : vector<1x128xf32> to vector<64x128xf32>
    %6 = arith.addf %3, %5 : vector<64x128xf32>
    %7 = vector.shape_cast %6 : vector<64x128xf32> to vector<8x8x128xf32>
    %c0_6 = arith.constant 0 : index
    %c0_7 = arith.constant 0 : index
    %8 = vector.load %arg3[%c0_6, %c0_7] : memref<32x128xf32, #tpu.memory_space<vmem>>, vector<32x128xf32>
    %c0_8 = arith.constant 0 : index
    %c0_9 = arith.constant 0 : index
    %9 = vector.load %arg5[%c0_8, %c0_9] : memref<32x128xf32, #tpu.memory_space<vmem>>, vector<32x128xf32>
    %c0_10 = arith.constant 0 : index
    %c0_11 = arith.constant 0 : index
    %10 = vector.load %arg6[%c0_10, %c0_11] : memref<32x128xf32, #tpu.memory_space<vmem>>, vector<32x128xf32>
    %c0_12 = arith.constant 0 : index
    %c0_13 = arith.constant 0 : index
    %11 = vector.load %arg7[%c0_12, %c0_13] : memref<1x128xf32, #tpu.memory_space<vmem>>, vector<1x128xf32>
    %12 = vector.shape_cast %11 : vector<1x128xf32> to vector<1x128xf32>
    %13 = vector.broadcast %12 : vector<1x128xf32> to vector<8x128xf32>
    %cst_14 = arith.constant 0.000000e+00 : f32
    %14 = vector.broadcast %cst_14 : f32 to vector<8x32xf32>
    %15 = vector.extract_strided_slice %7 {offsets = [0, 0, 0], sizes = [1, 8, 128], strides = [1, 1, 1]} : vector<8x8x128xf32> to vector<1x8x128xf32>
    %16 = vector.shape_cast %15 : vector<1x8x128xf32> to vector<8x128xf32>
    %cst_15 = arith.constant dense<0.000000e+00> : vector<8x128xf32>
    %17 = tpu.matmul %14, %8, %cst_15 {dimension_numbers = #tpu.dot_dimension_numbers<[1], [0], [0], [1], [0, 0, 1, 1], [], []>} : vector<8x32xf32>, vector<32x128xf32>, vector<8x128xf32> -> vector<8x128xf32>
    %18 = arith.addf %16, %17 : vector<8x128xf32>
    %19 = math.tanh %18 : vector<8x128xf32>
    %20 = vector.extract_strided_slice %19 {offsets = [0, 0], sizes = [8, 32], strides = [1, 1]} : vector<8x128xf32> to vector<8x32xf32>
    %cst_16 = arith.constant 1.000000e+00 : f32
    %21 = vector.broadcast %cst_16 : f32 to vector<8x32xf32>
    %22 = arith.addf %21, %20 : vector<8x32xf32>
    %cst_17 = arith.constant 5.000000e-01 : f32
    %23 = vector.broadcast %cst_17 : f32 to vector<8x32xf32>
    %24 = arith.mulf %23, %22 : vector<8x32xf32>
    %25 = vector.extract_strided_slice %19 {offsets = [0, 32], sizes = [8, 32], strides = [1, 1]} : vector<8x128xf32> to vector<8x32xf32>
    %cst_18 = arith.constant 1.000000e+00 : f32
    %26 = vector.broadcast %cst_18 : f32 to vector<8x32xf32>
    %27 = arith.addf %26, %25 : vector<8x32xf32>
    %cst_19 = arith.constant 5.000000e-01 : f32
    %28 = vector.broadcast %cst_19 : f32 to vector<8x32xf32>
    %29 = arith.mulf %28, %27 : vector<8x32xf32>
    %30 = vector.extract_strided_slice %19 {offsets = [0, 64], sizes = [8, 32], strides = [1, 1]} : vector<8x128xf32> to vector<8x32xf32>
    %31 = vector.extract_strided_slice %19 {offsets = [0, 96], sizes = [8, 32], strides = [1, 1]} : vector<8x128xf32> to vector<8x32xf32>
    %cst_20 = arith.constant 1.000000e+00 : f32
    %32 = vector.broadcast %cst_20 : f32 to vector<8x32xf32>
    %33 = arith.addf %32, %31 : vector<8x32xf32>
    %cst_21 = arith.constant 5.000000e-01 : f32
    %34 = vector.broadcast %cst_21 : f32 to vector<8x32xf32>
    %35 = arith.mulf %34, %33 : vector<8x32xf32>
    %36 = arith.mulf %29, %14 : vector<8x32xf32>
    %37 = arith.mulf %24, %30 : vector<8x32xf32>
    %38 = arith.addf %36, %37 : vector<8x32xf32>
    %39 = math.tanh %38 : vector<8x32xf32>
    %40 = arith.mulf %35, %39 : vector<8x32xf32>
    %cst_22 = arith.constant dense<0.000000e+00> : vector<8x128xf32>
    %41 = tpu.matmul %40, %9, %cst_22 {dimension_numbers = #tpu.dot_dimension_numbers<[1], [0], [0], [1], [0, 0, 1, 1], [], []>} : vector<8x32xf32>, vector<32x128xf32>, vector<8x128xf32> -> vector<8x128xf32>
    %cst_23 = arith.constant dense<0.000000e+00> : vector<8x128xf32>
    %42 = tpu.matmul %14, %10, %cst_23 {dimension_numbers = #tpu.dot_dimension_numbers<[1], [0], [0], [1], [0, 0, 1, 1], [], []>} : vector<8x32xf32>, vector<32x128xf32>, vector<8x128xf32> -> vector<8x128xf32>
    %43 = arith.addf %41, %42 : vector<8x128xf32>
    %44 = arith.addf %43, %13 : vector<8x128xf32>
    %45 = math.tanh %44 : vector<8x128xf32>
    %46 = vector.extract_strided_slice %45 {offsets = [0, 0], sizes = [8, 32], strides = [1, 1]} : vector<8x128xf32> to vector<8x32xf32>
    %cst_24 = arith.constant 1.000000e+00 : f32
    %47 = vector.broadcast %cst_24 : f32 to vector<8x32xf32>
    %48 = arith.addf %47, %46 : vector<8x32xf32>
    %cst_25 = arith.constant 5.000000e-01 : f32
    %49 = vector.broadcast %cst_25 : f32 to vector<8x32xf32>
    %50 = arith.mulf %49, %48 : vector<8x32xf32>
    %51 = vector.extract_strided_slice %45 {offsets = [0, 32], sizes = [8, 32], strides = [1, 1]} : vector<8x128xf32> to vector<8x32xf32>
    %cst_26 = arith.constant 1.000000e+00 : f32
    %52 = vector.broadcast %cst_26 : f32 to vector<8x32xf32>
    %53 = arith.addf %52, %51 : vector<8x32xf32>
    %cst_27 = arith.constant 5.000000e-01 : f32
    %54 = vector.broadcast %cst_27 : f32 to vector<8x32xf32>
    %55 = arith.mulf %54, %53 : vector<8x32xf32>
    %56 = vector.extract_strided_slice %45 {offsets = [0, 64], sizes = [8, 32], strides = [1, 1]} : vector<8x128xf32> to vector<8x32xf32>
    %57 = vector.extract_strided_slice %45 {offsets = [0, 96], sizes = [8, 32], strides = [1, 1]} : vector<8x128xf32> to vector<8x32xf32>
    %cst_28 = arith.constant 1.000000e+00 : f32
    %58 = vector.broadcast %cst_28 : f32 to vector<8x32xf32>
    %59 = arith.addf %58, %57 : vector<8x32xf32>
    %cst_29 = arith.constant 5.000000e-01 : f32
    %60 = vector.broadcast %cst_29 : f32 to vector<8x32xf32>
    %61 = arith.mulf %60, %59 : vector<8x32xf32>
    %62 = arith.mulf %55, %14 : vector<8x32xf32>
    %63 = arith.mulf %50, %56 : vector<8x32xf32>
    %64 = arith.addf %62, %63 : vector<8x32xf32>
    %65 = math.tanh %64 : vector<8x32xf32>
    %66 = arith.mulf %61, %65 : vector<8x32xf32>
    %67 = vector.extract_strided_slice %7 {offsets = [1, 0, 0], sizes = [1, 8, 128], strides = [1, 1, 1]} : vector<8x8x128xf32> to vector<1x8x128xf32>
    %68 = vector.shape_cast %67 : vector<1x8x128xf32> to vector<8x128xf32>
    %cst_30 = arith.constant dense<0.000000e+00> : vector<8x128xf32>
    %69 = tpu.matmul %40, %8, %cst_30 {dimension_numbers = #tpu.dot_dimension_numbers<[1], [0], [0], [1], [0, 0, 1, 1], [], []>} : vector<8x32xf32>, vector<32x128xf32>, vector<8x128xf32> -> vector<8x128xf32>
    %70 = arith.addf %68, %69 : vector<8x128xf32>
    %71 = math.tanh %70 : vector<8x128xf32>
    %72 = vector.extract_strided_slice %71 {offsets = [0, 0], sizes = [8, 32], strides = [1, 1]} : vector<8x128xf32> to vector<8x32xf32>
    %cst_31 = arith.constant 1.000000e+00 : f32
    %73 = vector.broadcast %cst_31 : f32 to vector<8x32xf32>
    %74 = arith.addf %73, %72 : vector<8x32xf32>
    %cst_32 = arith.constant 5.000000e-01 : f32
    %75 = vector.broadcast %cst_32 : f32 to vector<8x32xf32>
    %76 = arith.mulf %75, %74 : vector<8x32xf32>
    %77 = vector.extract_strided_slice %71 {offsets = [0, 32], sizes = [8, 32], strides = [1, 1]} : vector<8x128xf32> to vector<8x32xf32>
    %cst_33 = arith.constant 1.000000e+00 : f32
    %78 = vector.broadcast %cst_33 : f32 to vector<8x32xf32>
    %79 = arith.addf %78, %77 : vector<8x32xf32>
    %cst_34 = arith.constant 5.000000e-01 : f32
    %80 = vector.broadcast %cst_34 : f32 to vector<8x32xf32>
    %81 = arith.mulf %80, %79 : vector<8x32xf32>
    %82 = vector.extract_strided_slice %71 {offsets = [0, 64], sizes = [8, 32], strides = [1, 1]} : vector<8x128xf32> to vector<8x32xf32>
    %83 = vector.extract_strided_slice %71 {offsets = [0, 96], sizes = [8, 32], strides = [1, 1]} : vector<8x128xf32> to vector<8x32xf32>
    %cst_35 = arith.constant 1.000000e+00 : f32
    %84 = vector.broadcast %cst_35 : f32 to vector<8x32xf32>
    %85 = arith.addf %84, %83 : vector<8x32xf32>
    %cst_36 = arith.constant 5.000000e-01 : f32
    %86 = vector.broadcast %cst_36 : f32 to vector<8x32xf32>
    %87 = arith.mulf %86, %85 : vector<8x32xf32>
    %88 = arith.mulf %81, %38 : vector<8x32xf32>
    %89 = arith.mulf %76, %82 : vector<8x32xf32>
    %90 = arith.addf %88, %89 : vector<8x32xf32>
    %91 = math.tanh %90 : vector<8x32xf32>
    %92 = arith.mulf %87, %91 : vector<8x32xf32>
    %cst_37 = arith.constant dense<0.000000e+00> : vector<8x128xf32>
    %93 = tpu.matmul %92, %9, %cst_37 {dimension_numbers = #tpu.dot_dimension_numbers<[1], [0], [0], [1], [0, 0, 1, 1], [], []>} : vector<8x32xf32>, vector<32x128xf32>, vector<8x128xf32> -> vector<8x128xf32>
    %cst_38 = arith.constant dense<0.000000e+00> : vector<8x128xf32>
    %94 = tpu.matmul %66, %10, %cst_38 {dimension_numbers = #tpu.dot_dimension_numbers<[1], [0], [0], [1], [0, 0, 1, 1], [], []>} : vector<8x32xf32>, vector<32x128xf32>, vector<8x128xf32> -> vector<8x128xf32>
    %95 = arith.addf %93, %94 : vector<8x128xf32>
    %96 = arith.addf %95, %13 : vector<8x128xf32>
    %97 = math.tanh %96 : vector<8x128xf32>
    %98 = vector.extract_strided_slice %97 {offsets = [0, 0], sizes = [8, 32], strides = [1, 1]} : vector<8x128xf32> to vector<8x32xf32>
    %cst_39 = arith.constant 1.000000e+00 : f32
    %99 = vector.broadcast %cst_39 : f32 to vector<8x32xf32>
    %100 = arith.addf %99, %98 : vector<8x32xf32>
    %cst_40 = arith.constant 5.000000e-01 : f32
    %101 = vector.broadcast %cst_40 : f32 to vector<8x32xf32>
    %102 = arith.mulf %101, %100 : vector<8x32xf32>
    %103 = vector.extract_strided_slice %97 {offsets = [0, 32], sizes = [8, 32], strides = [1, 1]} : vector<8x128xf32> to vector<8x32xf32>
    %cst_41 = arith.constant 1.000000e+00 : f32
    %104 = vector.broadcast %cst_41 : f32 to vector<8x32xf32>
    %105 = arith.addf %104, %103 : vector<8x32xf32>
    %cst_42 = arith.constant 5.000000e-01 : f32
    %106 = vector.broadcast %cst_42 : f32 to vector<8x32xf32>
    %107 = arith.mulf %106, %105 : vector<8x32xf32>
    %108 = vector.extract_strided_slice %97 {offsets = [0, 64], sizes = [8, 32], strides = [1, 1]} : vector<8x128xf32> to vector<8x32xf32>
    %109 = vector.extract_strided_slice %97 {offsets = [0, 96], sizes = [8, 32], strides = [1, 1]} : vector<8x128xf32> to vector<8x32xf32>
    %cst_43 = arith.constant 1.000000e+00 : f32
    %110 = vector.broadcast %cst_43 : f32 to vector<8x32xf32>
    %111 = arith.addf %110, %109 : vector<8x32xf32>
    %cst_44 = arith.constant 5.000000e-01 : f32
    %112 = vector.broadcast %cst_44 : f32 to vector<8x32xf32>
    %113 = arith.mulf %112, %111 : vector<8x32xf32>
    %114 = arith.mulf %107, %64 : vector<8x32xf32>
    %115 = arith.mulf %102, %108 : vector<8x32xf32>
    %116 = arith.addf %114, %115 : vector<8x32xf32>
    %117 = math.tanh %116 : vector<8x32xf32>
    %118 = arith.mulf %113, %117 : vector<8x32xf32>
    %119 = vector.extract_strided_slice %7 {offsets = [2, 0, 0], sizes = [1, 8, 128], strides = [1, 1, 1]} : vector<8x8x128xf32> to vector<1x8x128xf32>
    %120 = vector.shape_cast %119 : vector<1x8x128xf32> to vector<8x128xf32>
    %cst_45 = arith.constant dense<0.000000e+00> : vector<8x128xf32>
    %121 = tpu.matmul %92, %8, %cst_45 {dimension_numbers = #tpu.dot_dimension_numbers<[1], [0], [0], [1], [0, 0, 1, 1], [], []>} : vector<8x32xf32>, vector<32x128xf32>, vector<8x128xf32> -> vector<8x128xf32>
    %122 = arith.addf %120, %121 : vector<8x128xf32>
    %123 = math.tanh %122 : vector<8x128xf32>
    %124 = vector.extract_strided_slice %123 {offsets = [0, 0], sizes = [8, 32], strides = [1, 1]} : vector<8x128xf32> to vector<8x32xf32>
    %cst_46 = arith.constant 1.000000e+00 : f32
    %125 = vector.broadcast %cst_46 : f32 to vector<8x32xf32>
    %126 = arith.addf %125, %124 : vector<8x32xf32>
    %cst_47 = arith.constant 5.000000e-01 : f32
    %127 = vector.broadcast %cst_47 : f32 to vector<8x32xf32>
    %128 = arith.mulf %127, %126 : vector<8x32xf32>
    %129 = vector.extract_strided_slice %123 {offsets = [0, 32], sizes = [8, 32], strides = [1, 1]} : vector<8x128xf32> to vector<8x32xf32>
    %cst_48 = arith.constant 1.000000e+00 : f32
    %130 = vector.broadcast %cst_48 : f32 to vector<8x32xf32>
    %131 = arith.addf %130, %129 : vector<8x32xf32>
    %cst_49 = arith.constant 5.000000e-01 : f32
    %132 = vector.broadcast %cst_49 : f32 to vector<8x32xf32>
    %133 = arith.mulf %132, %131 : vector<8x32xf32>
    %134 = vector.extract_strided_slice %123 {offsets = [0, 64], sizes = [8, 32], strides = [1, 1]} : vector<8x128xf32> to vector<8x32xf32>
    %135 = vector.extract_strided_slice %123 {offsets = [0, 96], sizes = [8, 32], strides = [1, 1]} : vector<8x128xf32> to vector<8x32xf32>
    %cst_50 = arith.constant 1.000000e+00 : f32
    %136 = vector.broadcast %cst_50 : f32 to vector<8x32xf32>
    %137 = arith.addf %136, %135 : vector<8x32xf32>
    %cst_51 = arith.constant 5.000000e-01 : f32
    %138 = vector.broadcast %cst_51 : f32 to vector<8x32xf32>
    %139 = arith.mulf %138, %137 : vector<8x32xf32>
    %140 = arith.mulf %133, %90 : vector<8x32xf32>
    %141 = arith.mulf %128, %134 : vector<8x32xf32>
    %142 = arith.addf %140, %141 : vector<8x32xf32>
    %143 = math.tanh %142 : vector<8x32xf32>
    %144 = arith.mulf %139, %143 : vector<8x32xf32>
    %cst_52 = arith.constant dense<0.000000e+00> : vector<8x128xf32>
    %145 = tpu.matmul %144, %9, %cst_52 {dimension_numbers = #tpu.dot_dimension_numbers<[1], [0], [0], [1], [0, 0, 1, 1], [], []>} : vector<8x32xf32>, vector<32x128xf32>, vector<8x128xf32> -> vector<8x128xf32>
    %cst_53 = arith.constant dense<0.000000e+00> : vector<8x128xf32>
    %146 = tpu.matmul %118, %10, %cst_53 {dimension_numbers = #tpu.dot_dimension_numbers<[1], [0], [0], [1], [0, 0, 1, 1], [], []>} : vector<8x32xf32>, vector<32x128xf32>, vector<8x128xf32> -> vector<8x128xf32>
    %147 = arith.addf %145, %146 : vector<8x128xf32>
    %148 = arith.addf %147, %13 : vector<8x128xf32>
    %149 = math.tanh %148 : vector<8x128xf32>
    %150 = vector.extract_strided_slice %149 {offsets = [0, 0], sizes = [8, 32], strides = [1, 1]} : vector<8x128xf32> to vector<8x32xf32>
    %cst_54 = arith.constant 1.000000e+00 : f32
    %151 = vector.broadcast %cst_54 : f32 to vector<8x32xf32>
    %152 = arith.addf %151, %150 : vector<8x32xf32>
    %cst_55 = arith.constant 5.000000e-01 : f32
    %153 = vector.broadcast %cst_55 : f32 to vector<8x32xf32>
    %154 = arith.mulf %153, %152 : vector<8x32xf32>
    %155 = vector.extract_strided_slice %149 {offsets = [0, 32], sizes = [8, 32], strides = [1, 1]} : vector<8x128xf32> to vector<8x32xf32>
    %cst_56 = arith.constant 1.000000e+00 : f32
    %156 = vector.broadcast %cst_56 : f32 to vector<8x32xf32>
    %157 = arith.addf %156, %155 : vector<8x32xf32>
    %cst_57 = arith.constant 5.000000e-01 : f32
    %158 = vector.broadcast %cst_57 : f32 to vector<8x32xf32>
    %159 = arith.mulf %158, %157 : vector<8x32xf32>
    %160 = vector.extract_strided_slice %149 {offsets = [0, 64], sizes = [8, 32], strides = [1, 1]} : vector<8x128xf32> to vector<8x32xf32>
    %161 = vector.extract_strided_slice %149 {offsets = [0, 96], sizes = [8, 32], strides = [1, 1]} : vector<8x128xf32> to vector<8x32xf32>
    %cst_58 = arith.constant 1.000000e+00 : f32
    %162 = vector.broadcast %cst_58 : f32 to vector<8x32xf32>
    %163 = arith.addf %162, %161 : vector<8x32xf32>
    %cst_59 = arith.constant 5.000000e-01 : f32
    %164 = vector.broadcast %cst_59 : f32 to vector<8x32xf32>
    %165 = arith.mulf %164, %163 : vector<8x32xf32>
    %166 = arith.mulf %159, %116 : vector<8x32xf32>
    %167 = arith.mulf %154, %160 : vector<8x32xf32>
    %168 = arith.addf %166, %167 : vector<8x32xf32>
    %169 = math.tanh %168 : vector<8x32xf32>
    %170 = arith.mulf %165, %169 : vector<8x32xf32>
    %171 = vector.extract_strided_slice %7 {offsets = [3, 0, 0], sizes = [1, 8, 128], strides = [1, 1, 1]} : vector<8x8x128xf32> to vector<1x8x128xf32>
    %172 = vector.shape_cast %171 : vector<1x8x128xf32> to vector<8x128xf32>
    %cst_60 = arith.constant dense<0.000000e+00> : vector<8x128xf32>
    %173 = tpu.matmul %144, %8, %cst_60 {dimension_numbers = #tpu.dot_dimension_numbers<[1], [0], [0], [1], [0, 0, 1, 1], [], []>} : vector<8x32xf32>, vector<32x128xf32>, vector<8x128xf32> -> vector<8x128xf32>
    %174 = arith.addf %172, %173 : vector<8x128xf32>
    %175 = math.tanh %174 : vector<8x128xf32>
    %176 = vector.extract_strided_slice %175 {offsets = [0, 0], sizes = [8, 32], strides = [1, 1]} : vector<8x128xf32> to vector<8x32xf32>
    %cst_61 = arith.constant 1.000000e+00 : f32
    %177 = vector.broadcast %cst_61 : f32 to vector<8x32xf32>
    %178 = arith.addf %177, %176 : vector<8x32xf32>
    %cst_62 = arith.constant 5.000000e-01 : f32
    %179 = vector.broadcast %cst_62 : f32 to vector<8x32xf32>
    %180 = arith.mulf %179, %178 : vector<8x32xf32>
    %181 = vector.extract_strided_slice %175 {offsets = [0, 32], sizes = [8, 32], strides = [1, 1]} : vector<8x128xf32> to vector<8x32xf32>
    %cst_63 = arith.constant 1.000000e+00 : f32
    %182 = vector.broadcast %cst_63 : f32 to vector<8x32xf32>
    %183 = arith.addf %182, %181 : vector<8x32xf32>
    %cst_64 = arith.constant 5.000000e-01 : f32
    %184 = vector.broadcast %cst_64 : f32 to vector<8x32xf32>
    %185 = arith.mulf %184, %183 : vector<8x32xf32>
    %186 = vector.extract_strided_slice %175 {offsets = [0, 64], sizes = [8, 32], strides = [1, 1]} : vector<8x128xf32> to vector<8x32xf32>
    %187 = vector.extract_strided_slice %175 {offsets = [0, 96], sizes = [8, 32], strides = [1, 1]} : vector<8x128xf32> to vector<8x32xf32>
    %cst_65 = arith.constant 1.000000e+00 : f32
    %188 = vector.broadcast %cst_65 : f32 to vector<8x32xf32>
    %189 = arith.addf %188, %187 : vector<8x32xf32>
    %cst_66 = arith.constant 5.000000e-01 : f32
    %190 = vector.broadcast %cst_66 : f32 to vector<8x32xf32>
    %191 = arith.mulf %190, %189 : vector<8x32xf32>
    %192 = arith.mulf %185, %142 : vector<8x32xf32>
    %193 = arith.mulf %180, %186 : vector<8x32xf32>
    %194 = arith.addf %192, %193 : vector<8x32xf32>
    %195 = math.tanh %194 : vector<8x32xf32>
    %196 = arith.mulf %191, %195 : vector<8x32xf32>
    %cst_67 = arith.constant dense<0.000000e+00> : vector<8x128xf32>
    %197 = tpu.matmul %196, %9, %cst_67 {dimension_numbers = #tpu.dot_dimension_numbers<[1], [0], [0], [1], [0, 0, 1, 1], [], []>} : vector<8x32xf32>, vector<32x128xf32>, vector<8x128xf32> -> vector<8x128xf32>
    %cst_68 = arith.constant dense<0.000000e+00> : vector<8x128xf32>
    %198 = tpu.matmul %170, %10, %cst_68 {dimension_numbers = #tpu.dot_dimension_numbers<[1], [0], [0], [1], [0, 0, 1, 1], [], []>} : vector<8x32xf32>, vector<32x128xf32>, vector<8x128xf32> -> vector<8x128xf32>
    %199 = arith.addf %197, %198 : vector<8x128xf32>
    %200 = arith.addf %199, %13 : vector<8x128xf32>
    %201 = math.tanh %200 : vector<8x128xf32>
    %202 = vector.extract_strided_slice %201 {offsets = [0, 0], sizes = [8, 32], strides = [1, 1]} : vector<8x128xf32> to vector<8x32xf32>
    %cst_69 = arith.constant 1.000000e+00 : f32
    %203 = vector.broadcast %cst_69 : f32 to vector<8x32xf32>
    %204 = arith.addf %203, %202 : vector<8x32xf32>
    %cst_70 = arith.constant 5.000000e-01 : f32
    %205 = vector.broadcast %cst_70 : f32 to vector<8x32xf32>
    %206 = arith.mulf %205, %204 : vector<8x32xf32>
    %207 = vector.extract_strided_slice %201 {offsets = [0, 32], sizes = [8, 32], strides = [1, 1]} : vector<8x128xf32> to vector<8x32xf32>
    %cst_71 = arith.constant 1.000000e+00 : f32
    %208 = vector.broadcast %cst_71 : f32 to vector<8x32xf32>
    %209 = arith.addf %208, %207 : vector<8x32xf32>
    %cst_72 = arith.constant 5.000000e-01 : f32
    %210 = vector.broadcast %cst_72 : f32 to vector<8x32xf32>
    %211 = arith.mulf %210, %209 : vector<8x32xf32>
    %212 = vector.extract_strided_slice %201 {offsets = [0, 64], sizes = [8, 32], strides = [1, 1]} : vector<8x128xf32> to vector<8x32xf32>
    %213 = vector.extract_strided_slice %201 {offsets = [0, 96], sizes = [8, 32], strides = [1, 1]} : vector<8x128xf32> to vector<8x32xf32>
    %cst_73 = arith.constant 1.000000e+00 : f32
    %214 = vector.broadcast %cst_73 : f32 to vector<8x32xf32>
    %215 = arith.addf %214, %213 : vector<8x32xf32>
    %cst_74 = arith.constant 5.000000e-01 : f32
    %216 = vector.broadcast %cst_74 : f32 to vector<8x32xf32>
    %217 = arith.mulf %216, %215 : vector<8x32xf32>
    %218 = arith.mulf %211, %168 : vector<8x32xf32>
    %219 = arith.mulf %206, %212 : vector<8x32xf32>
    %220 = arith.addf %218, %219 : vector<8x32xf32>
    %221 = math.tanh %220 : vector<8x32xf32>
    %222 = arith.mulf %217, %221 : vector<8x32xf32>
    %223 = vector.extract_strided_slice %7 {offsets = [4, 0, 0], sizes = [1, 8, 128], strides = [1, 1, 1]} : vector<8x8x128xf32> to vector<1x8x128xf32>
    %224 = vector.shape_cast %223 : vector<1x8x128xf32> to vector<8x128xf32>
    %cst_75 = arith.constant dense<0.000000e+00> : vector<8x128xf32>
    %225 = tpu.matmul %196, %8, %cst_75 {dimension_numbers = #tpu.dot_dimension_numbers<[1], [0], [0], [1], [0, 0, 1, 1], [], []>} : vector<8x32xf32>, vector<32x128xf32>, vector<8x128xf32> -> vector<8x128xf32>
    %226 = arith.addf %224, %225 : vector<8x128xf32>
    %227 = math.tanh %226 : vector<8x128xf32>
    %228 = vector.extract_strided_slice %227 {offsets = [0, 0], sizes = [8, 32], strides = [1, 1]} : vector<8x128xf32> to vector<8x32xf32>
    %cst_76 = arith.constant 1.000000e+00 : f32
    %229 = vector.broadcast %cst_76 : f32 to vector<8x32xf32>
    %230 = arith.addf %229, %228 : vector<8x32xf32>
    %cst_77 = arith.constant 5.000000e-01 : f32
    %231 = vector.broadcast %cst_77 : f32 to vector<8x32xf32>
    %232 = arith.mulf %231, %230 : vector<8x32xf32>
    %233 = vector.extract_strided_slice %227 {offsets = [0, 32], sizes = [8, 32], strides = [1, 1]} : vector<8x128xf32> to vector<8x32xf32>
    %cst_78 = arith.constant 1.000000e+00 : f32
    %234 = vector.broadcast %cst_78 : f32 to vector<8x32xf32>
    %235 = arith.addf %234, %233 : vector<8x32xf32>
    %cst_79 = arith.constant 5.000000e-01 : f32
    %236 = vector.broadcast %cst_79 : f32 to vector<8x32xf32>
    %237 = arith.mulf %236, %235 : vector<8x32xf32>
    %238 = vector.extract_strided_slice %227 {offsets = [0, 64], sizes = [8, 32], strides = [1, 1]} : vector<8x128xf32> to vector<8x32xf32>
    %239 = vector.extract_strided_slice %227 {offsets = [0, 96], sizes = [8, 32], strides = [1, 1]} : vector<8x128xf32> to vector<8x32xf32>
    %cst_80 = arith.constant 1.000000e+00 : f32
    %240 = vector.broadcast %cst_80 : f32 to vector<8x32xf32>
    %241 = arith.addf %240, %239 : vector<8x32xf32>
    %cst_81 = arith.constant 5.000000e-01 : f32
    %242 = vector.broadcast %cst_81 : f32 to vector<8x32xf32>
    %243 = arith.mulf %242, %241 : vector<8x32xf32>
    %244 = arith.mulf %237, %194 : vector<8x32xf32>
    %245 = arith.mulf %232, %238 : vector<8x32xf32>
    %246 = arith.addf %244, %245 : vector<8x32xf32>
    %247 = math.tanh %246 : vector<8x32xf32>
    %248 = arith.mulf %243, %247 : vector<8x32xf32>
    %cst_82 = arith.constant dense<0.000000e+00> : vector<8x128xf32>
    %249 = tpu.matmul %248, %9, %cst_82 {dimension_numbers = #tpu.dot_dimension_numbers<[1], [0], [0], [1], [0, 0, 1, 1], [], []>} : vector<8x32xf32>, vector<32x128xf32>, vector<8x128xf32> -> vector<8x128xf32>
    %cst_83 = arith.constant dense<0.000000e+00> : vector<8x128xf32>
    %250 = tpu.matmul %222, %10, %cst_83 {dimension_numbers = #tpu.dot_dimension_numbers<[1], [0], [0], [1], [0, 0, 1, 1], [], []>} : vector<8x32xf32>, vector<32x128xf32>, vector<8x128xf32> -> vector<8x128xf32>
    %251 = arith.addf %249, %250 : vector<8x128xf32>
    %252 = arith.addf %251, %13 : vector<8x128xf32>
    %253 = math.tanh %252 : vector<8x128xf32>
    %254 = vector.extract_strided_slice %253 {offsets = [0, 0], sizes = [8, 32], strides = [1, 1]} : vector<8x128xf32> to vector<8x32xf32>
    %cst_84 = arith.constant 1.000000e+00 : f32
    %255 = vector.broadcast %cst_84 : f32 to vector<8x32xf32>
    %256 = arith.addf %255, %254 : vector<8x32xf32>
    %cst_85 = arith.constant 5.000000e-01 : f32
    %257 = vector.broadcast %cst_85 : f32 to vector<8x32xf32>
    %258 = arith.mulf %257, %256 : vector<8x32xf32>
    %259 = vector.extract_strided_slice %253 {offsets = [0, 32], sizes = [8, 32], strides = [1, 1]} : vector<8x128xf32> to vector<8x32xf32>
    %cst_86 = arith.constant 1.000000e+00 : f32
    %260 = vector.broadcast %cst_86 : f32 to vector<8x32xf32>
    %261 = arith.addf %260, %259 : vector<8x32xf32>
    %cst_87 = arith.constant 5.000000e-01 : f32
    %262 = vector.broadcast %cst_87 : f32 to vector<8x32xf32>
    %263 = arith.mulf %262, %261 : vector<8x32xf32>
    %264 = vector.extract_strided_slice %253 {offsets = [0, 64], sizes = [8, 32], strides = [1, 1]} : vector<8x128xf32> to vector<8x32xf32>
    %265 = vector.extract_strided_slice %253 {offsets = [0, 96], sizes = [8, 32], strides = [1, 1]} : vector<8x128xf32> to vector<8x32xf32>
    %cst_88 = arith.constant 1.000000e+00 : f32
    %266 = vector.broadcast %cst_88 : f32 to vector<8x32xf32>
    %267 = arith.addf %266, %265 : vector<8x32xf32>
    %cst_89 = arith.constant 5.000000e-01 : f32
    %268 = vector.broadcast %cst_89 : f32 to vector<8x32xf32>
    %269 = arith.mulf %268, %267 : vector<8x32xf32>
    %270 = arith.mulf %263, %220 : vector<8x32xf32>
    %271 = arith.mulf %258, %264 : vector<8x32xf32>
    %272 = arith.addf %270, %271 : vector<8x32xf32>
    %273 = math.tanh %272 : vector<8x32xf32>
    %274 = arith.mulf %269, %273 : vector<8x32xf32>
    %275 = vector.extract_strided_slice %7 {offsets = [5, 0, 0], sizes = [1, 8, 128], strides = [1, 1, 1]} : vector<8x8x128xf32> to vector<1x8x128xf32>
    %276 = vector.shape_cast %275 : vector<1x8x128xf32> to vector<8x128xf32>
    %cst_90 = arith.constant dense<0.000000e+00> : vector<8x128xf32>
    %277 = tpu.matmul %248, %8, %cst_90 {dimension_numbers = #tpu.dot_dimension_numbers<[1], [0], [0], [1], [0, 0, 1, 1], [], []>} : vector<8x32xf32>, vector<32x128xf32>, vector<8x128xf32> -> vector<8x128xf32>
    %278 = arith.addf %276, %277 : vector<8x128xf32>
    %279 = math.tanh %278 : vector<8x128xf32>
    %280 = vector.extract_strided_slice %279 {offsets = [0, 0], sizes = [8, 32], strides = [1, 1]} : vector<8x128xf32> to vector<8x32xf32>
    %cst_91 = arith.constant 1.000000e+00 : f32
    %281 = vector.broadcast %cst_91 : f32 to vector<8x32xf32>
    %282 = arith.addf %281, %280 : vector<8x32xf32>
    %cst_92 = arith.constant 5.000000e-01 : f32
    %283 = vector.broadcast %cst_92 : f32 to vector<8x32xf32>
    %284 = arith.mulf %283, %282 : vector<8x32xf32>
    %285 = vector.extract_strided_slice %279 {offsets = [0, 32], sizes = [8, 32], strides = [1, 1]} : vector<8x128xf32> to vector<8x32xf32>
    %cst_93 = arith.constant 1.000000e+00 : f32
    %286 = vector.broadcast %cst_93 : f32 to vector<8x32xf32>
    %287 = arith.addf %286, %285 : vector<8x32xf32>
    %cst_94 = arith.constant 5.000000e-01 : f32
    %288 = vector.broadcast %cst_94 : f32 to vector<8x32xf32>
    %289 = arith.mulf %288, %287 : vector<8x32xf32>
    %290 = vector.extract_strided_slice %279 {offsets = [0, 64], sizes = [8, 32], strides = [1, 1]} : vector<8x128xf32> to vector<8x32xf32>
    %291 = vector.extract_strided_slice %279 {offsets = [0, 96], sizes = [8, 32], strides = [1, 1]} : vector<8x128xf32> to vector<8x32xf32>
    %cst_95 = arith.constant 1.000000e+00 : f32
    %292 = vector.broadcast %cst_95 : f32 to vector<8x32xf32>
    %293 = arith.addf %292, %291 : vector<8x32xf32>
    %cst_96 = arith.constant 5.000000e-01 : f32
    %294 = vector.broadcast %cst_96 : f32 to vector<8x32xf32>
    %295 = arith.mulf %294, %293 : vector<8x32xf32>
    %296 = arith.mulf %289, %246 : vector<8x32xf32>
    %297 = arith.mulf %284, %290 : vector<8x32xf32>
    %298 = arith.addf %296, %297 : vector<8x32xf32>
    %299 = math.tanh %298 : vector<8x32xf32>
    %300 = arith.mulf %295, %299 : vector<8x32xf32>
    %cst_97 = arith.constant dense<0.000000e+00> : vector<8x128xf32>
    %301 = tpu.matmul %300, %9, %cst_97 {dimension_numbers = #tpu.dot_dimension_numbers<[1], [0], [0], [1], [0, 0, 1, 1], [], []>} : vector<8x32xf32>, vector<32x128xf32>, vector<8x128xf32> -> vector<8x128xf32>
    %cst_98 = arith.constant dense<0.000000e+00> : vector<8x128xf32>
    %302 = tpu.matmul %274, %10, %cst_98 {dimension_numbers = #tpu.dot_dimension_numbers<[1], [0], [0], [1], [0, 0, 1, 1], [], []>} : vector<8x32xf32>, vector<32x128xf32>, vector<8x128xf32> -> vector<8x128xf32>
    %303 = arith.addf %301, %302 : vector<8x128xf32>
    %304 = arith.addf %303, %13 : vector<8x128xf32>
    %305 = math.tanh %304 : vector<8x128xf32>
    %306 = vector.extract_strided_slice %305 {offsets = [0, 0], sizes = [8, 32], strides = [1, 1]} : vector<8x128xf32> to vector<8x32xf32>
    %cst_99 = arith.constant 1.000000e+00 : f32
    %307 = vector.broadcast %cst_99 : f32 to vector<8x32xf32>
    %308 = arith.addf %307, %306 : vector<8x32xf32>
    %cst_100 = arith.constant 5.000000e-01 : f32
    %309 = vector.broadcast %cst_100 : f32 to vector<8x32xf32>
    %310 = arith.mulf %309, %308 : vector<8x32xf32>
    %311 = vector.extract_strided_slice %305 {offsets = [0, 32], sizes = [8, 32], strides = [1, 1]} : vector<8x128xf32> to vector<8x32xf32>
    %cst_101 = arith.constant 1.000000e+00 : f32
    %312 = vector.broadcast %cst_101 : f32 to vector<8x32xf32>
    %313 = arith.addf %312, %311 : vector<8x32xf32>
    %cst_102 = arith.constant 5.000000e-01 : f32
    %314 = vector.broadcast %cst_102 : f32 to vector<8x32xf32>
    %315 = arith.mulf %314, %313 : vector<8x32xf32>
    %316 = vector.extract_strided_slice %305 {offsets = [0, 64], sizes = [8, 32], strides = [1, 1]} : vector<8x128xf32> to vector<8x32xf32>
    %317 = vector.extract_strided_slice %305 {offsets = [0, 96], sizes = [8, 32], strides = [1, 1]} : vector<8x128xf32> to vector<8x32xf32>
    %cst_103 = arith.constant 1.000000e+00 : f32
    %318 = vector.broadcast %cst_103 : f32 to vector<8x32xf32>
    %319 = arith.addf %318, %317 : vector<8x32xf32>
    %cst_104 = arith.constant 5.000000e-01 : f32
    %320 = vector.broadcast %cst_104 : f32 to vector<8x32xf32>
    %321 = arith.mulf %320, %319 : vector<8x32xf32>
    %322 = arith.mulf %315, %272 : vector<8x32xf32>
    %323 = arith.mulf %310, %316 : vector<8x32xf32>
    %324 = arith.addf %322, %323 : vector<8x32xf32>
    %325 = math.tanh %324 : vector<8x32xf32>
    %326 = arith.mulf %321, %325 : vector<8x32xf32>
    %327 = vector.extract_strided_slice %7 {offsets = [6, 0, 0], sizes = [1, 8, 128], strides = [1, 1, 1]} : vector<8x8x128xf32> to vector<1x8x128xf32>
    %328 = vector.shape_cast %327 : vector<1x8x128xf32> to vector<8x128xf32>
    %cst_105 = arith.constant dense<0.000000e+00> : vector<8x128xf32>
    %329 = tpu.matmul %300, %8, %cst_105 {dimension_numbers = #tpu.dot_dimension_numbers<[1], [0], [0], [1], [0, 0, 1, 1], [], []>} : vector<8x32xf32>, vector<32x128xf32>, vector<8x128xf32> -> vector<8x128xf32>
    %330 = arith.addf %328, %329 : vector<8x128xf32>
    %331 = math.tanh %330 : vector<8x128xf32>
    %332 = vector.extract_strided_slice %331 {offsets = [0, 0], sizes = [8, 32], strides = [1, 1]} : vector<8x128xf32> to vector<8x32xf32>
    %cst_106 = arith.constant 1.000000e+00 : f32
    %333 = vector.broadcast %cst_106 : f32 to vector<8x32xf32>
    %334 = arith.addf %333, %332 : vector<8x32xf32>
    %cst_107 = arith.constant 5.000000e-01 : f32
    %335 = vector.broadcast %cst_107 : f32 to vector<8x32xf32>
    %336 = arith.mulf %335, %334 : vector<8x32xf32>
    %337 = vector.extract_strided_slice %331 {offsets = [0, 32], sizes = [8, 32], strides = [1, 1]} : vector<8x128xf32> to vector<8x32xf32>
    %cst_108 = arith.constant 1.000000e+00 : f32
    %338 = vector.broadcast %cst_108 : f32 to vector<8x32xf32>
    %339 = arith.addf %338, %337 : vector<8x32xf32>
    %cst_109 = arith.constant 5.000000e-01 : f32
    %340 = vector.broadcast %cst_109 : f32 to vector<8x32xf32>
    %341 = arith.mulf %340, %339 : vector<8x32xf32>
    %342 = vector.extract_strided_slice %331 {offsets = [0, 64], sizes = [8, 32], strides = [1, 1]} : vector<8x128xf32> to vector<8x32xf32>
    %343 = vector.extract_strided_slice %331 {offsets = [0, 96], sizes = [8, 32], strides = [1, 1]} : vector<8x128xf32> to vector<8x32xf32>
    %cst_110 = arith.constant 1.000000e+00 : f32
    %344 = vector.broadcast %cst_110 : f32 to vector<8x32xf32>
    %345 = arith.addf %344, %343 : vector<8x32xf32>
    %cst_111 = arith.constant 5.000000e-01 : f32
    %346 = vector.broadcast %cst_111 : f32 to vector<8x32xf32>
    %347 = arith.mulf %346, %345 : vector<8x32xf32>
    %348 = arith.mulf %341, %298 : vector<8x32xf32>
    %349 = arith.mulf %336, %342 : vector<8x32xf32>
    %350 = arith.addf %348, %349 : vector<8x32xf32>
    %351 = math.tanh %350 : vector<8x32xf32>
    %352 = arith.mulf %347, %351 : vector<8x32xf32>
    %cst_112 = arith.constant dense<0.000000e+00> : vector<8x128xf32>
    %353 = tpu.matmul %352, %9, %cst_112 {dimension_numbers = #tpu.dot_dimension_numbers<[1], [0], [0], [1], [0, 0, 1, 1], [], []>} : vector<8x32xf32>, vector<32x128xf32>, vector<8x128xf32> -> vector<8x128xf32>
    %cst_113 = arith.constant dense<0.000000e+00> : vector<8x128xf32>
    %354 = tpu.matmul %326, %10, %cst_113 {dimension_numbers = #tpu.dot_dimension_numbers<[1], [0], [0], [1], [0, 0, 1, 1], [], []>} : vector<8x32xf32>, vector<32x128xf32>, vector<8x128xf32> -> vector<8x128xf32>
    %355 = arith.addf %353, %354 : vector<8x128xf32>
    %356 = arith.addf %355, %13 : vector<8x128xf32>
    %357 = math.tanh %356 : vector<8x128xf32>
    %358 = vector.extract_strided_slice %357 {offsets = [0, 0], sizes = [8, 32], strides = [1, 1]} : vector<8x128xf32> to vector<8x32xf32>
    %cst_114 = arith.constant 1.000000e+00 : f32
    %359 = vector.broadcast %cst_114 : f32 to vector<8x32xf32>
    %360 = arith.addf %359, %358 : vector<8x32xf32>
    %cst_115 = arith.constant 5.000000e-01 : f32
    %361 = vector.broadcast %cst_115 : f32 to vector<8x32xf32>
    %362 = arith.mulf %361, %360 : vector<8x32xf32>
    %363 = vector.extract_strided_slice %357 {offsets = [0, 32], sizes = [8, 32], strides = [1, 1]} : vector<8x128xf32> to vector<8x32xf32>
    %cst_116 = arith.constant 1.000000e+00 : f32
    %364 = vector.broadcast %cst_116 : f32 to vector<8x32xf32>
    %365 = arith.addf %364, %363 : vector<8x32xf32>
    %cst_117 = arith.constant 5.000000e-01 : f32
    %366 = vector.broadcast %cst_117 : f32 to vector<8x32xf32>
    %367 = arith.mulf %366, %365 : vector<8x32xf32>
    %368 = vector.extract_strided_slice %357 {offsets = [0, 64], sizes = [8, 32], strides = [1, 1]} : vector<8x128xf32> to vector<8x32xf32>
    %369 = vector.extract_strided_slice %357 {offsets = [0, 96], sizes = [8, 32], strides = [1, 1]} : vector<8x128xf32> to vector<8x32xf32>
    %cst_118 = arith.constant 1.000000e+00 : f32
    %370 = vector.broadcast %cst_118 : f32 to vector<8x32xf32>
    %371 = arith.addf %370, %369 : vector<8x32xf32>
    %cst_119 = arith.constant 5.000000e-01 : f32
    %372 = vector.broadcast %cst_119 : f32 to vector<8x32xf32>
    %373 = arith.mulf %372, %371 : vector<8x32xf32>
    %374 = arith.mulf %367, %324 : vector<8x32xf32>
    %375 = arith.mulf %362, %368 : vector<8x32xf32>
    %376 = arith.addf %374, %375 : vector<8x32xf32>
    %377 = math.tanh %376 : vector<8x32xf32>
    %378 = arith.mulf %373, %377 : vector<8x32xf32>
    %379 = vector.extract_strided_slice %7 {offsets = [7, 0, 0], sizes = [1, 8, 128], strides = [1, 1, 1]} : vector<8x8x128xf32> to vector<1x8x128xf32>
    %380 = vector.shape_cast %379 : vector<1x8x128xf32> to vector<8x128xf32>
    %cst_120 = arith.constant dense<0.000000e+00> : vector<8x128xf32>
    %381 = tpu.matmul %352, %8, %cst_120 {dimension_numbers = #tpu.dot_dimension_numbers<[1], [0], [0], [1], [0, 0, 1, 1], [], []>} : vector<8x32xf32>, vector<32x128xf32>, vector<8x128xf32> -> vector<8x128xf32>
    %382 = arith.addf %380, %381 : vector<8x128xf32>
    %383 = math.tanh %382 : vector<8x128xf32>
    %384 = vector.extract_strided_slice %383 {offsets = [0, 0], sizes = [8, 32], strides = [1, 1]} : vector<8x128xf32> to vector<8x32xf32>
    %cst_121 = arith.constant 1.000000e+00 : f32
    %385 = vector.broadcast %cst_121 : f32 to vector<8x32xf32>
    %386 = arith.addf %385, %384 : vector<8x32xf32>
    %cst_122 = arith.constant 5.000000e-01 : f32
    %387 = vector.broadcast %cst_122 : f32 to vector<8x32xf32>
    %388 = arith.mulf %387, %386 : vector<8x32xf32>
    %389 = vector.extract_strided_slice %383 {offsets = [0, 32], sizes = [8, 32], strides = [1, 1]} : vector<8x128xf32> to vector<8x32xf32>
    %cst_123 = arith.constant 1.000000e+00 : f32
    %390 = vector.broadcast %cst_123 : f32 to vector<8x32xf32>
    %391 = arith.addf %390, %389 : vector<8x32xf32>
    %cst_124 = arith.constant 5.000000e-01 : f32
    %392 = vector.broadcast %cst_124 : f32 to vector<8x32xf32>
    %393 = arith.mulf %392, %391 : vector<8x32xf32>
    %394 = vector.extract_strided_slice %383 {offsets = [0, 64], sizes = [8, 32], strides = [1, 1]} : vector<8x128xf32> to vector<8x32xf32>
    %395 = vector.extract_strided_slice %383 {offsets = [0, 96], sizes = [8, 32], strides = [1, 1]} : vector<8x128xf32> to vector<8x32xf32>
    %cst_125 = arith.constant 1.000000e+00 : f32
    %396 = vector.broadcast %cst_125 : f32 to vector<8x32xf32>
    %397 = arith.addf %396, %395 : vector<8x32xf32>
    %cst_126 = arith.constant 5.000000e-01 : f32
    %398 = vector.broadcast %cst_126 : f32 to vector<8x32xf32>
    %399 = arith.mulf %398, %397 : vector<8x32xf32>
    %400 = arith.mulf %393, %350 : vector<8x32xf32>
    %401 = arith.mulf %388, %394 : vector<8x32xf32>
    %402 = arith.addf %400, %401 : vector<8x32xf32>
    %403 = math.tanh %402 : vector<8x32xf32>
    %404 = arith.mulf %399, %403 : vector<8x32xf32>
    %cst_127 = arith.constant dense<0.000000e+00> : vector<8x128xf32>
    %405 = tpu.matmul %404, %9, %cst_127 {dimension_numbers = #tpu.dot_dimension_numbers<[1], [0], [0], [1], [0, 0, 1, 1], [], []>} : vector<8x32xf32>, vector<32x128xf32>, vector<8x128xf32> -> vector<8x128xf32>
    %cst_128 = arith.constant dense<0.000000e+00> : vector<8x128xf32>
    %406 = tpu.matmul %378, %10, %cst_128 {dimension_numbers = #tpu.dot_dimension_numbers<[1], [0], [0], [1], [0, 0, 1, 1], [], []>} : vector<8x32xf32>, vector<32x128xf32>, vector<8x128xf32> -> vector<8x128xf32>
    %407 = arith.addf %405, %406 : vector<8x128xf32>
    %408 = arith.addf %407, %13 : vector<8x128xf32>
    %409 = math.tanh %408 : vector<8x128xf32>
    %410 = vector.extract_strided_slice %409 {offsets = [0, 0], sizes = [8, 32], strides = [1, 1]} : vector<8x128xf32> to vector<8x32xf32>
    %cst_129 = arith.constant 1.000000e+00 : f32
    %411 = vector.broadcast %cst_129 : f32 to vector<8x32xf32>
    %412 = arith.addf %411, %410 : vector<8x32xf32>
    %cst_130 = arith.constant 5.000000e-01 : f32
    %413 = vector.broadcast %cst_130 : f32 to vector<8x32xf32>
    %414 = arith.mulf %413, %412 : vector<8x32xf32>
    %415 = vector.extract_strided_slice %409 {offsets = [0, 32], sizes = [8, 32], strides = [1, 1]} : vector<8x128xf32> to vector<8x32xf32>
    %cst_131 = arith.constant 1.000000e+00 : f32
    %416 = vector.broadcast %cst_131 : f32 to vector<8x32xf32>
    %417 = arith.addf %416, %415 : vector<8x32xf32>
    %cst_132 = arith.constant 5.000000e-01 : f32
    %418 = vector.broadcast %cst_132 : f32 to vector<8x32xf32>
    %419 = arith.mulf %418, %417 : vector<8x32xf32>
    %420 = vector.extract_strided_slice %409 {offsets = [0, 64], sizes = [8, 32], strides = [1, 1]} : vector<8x128xf32> to vector<8x32xf32>
    %421 = vector.extract_strided_slice %409 {offsets = [0, 96], sizes = [8, 32], strides = [1, 1]} : vector<8x128xf32> to vector<8x32xf32>
    %cst_133 = arith.constant 1.000000e+00 : f32
    %422 = vector.broadcast %cst_133 : f32 to vector<8x32xf32>
    %423 = arith.addf %422, %421 : vector<8x32xf32>
    %cst_134 = arith.constant 5.000000e-01 : f32
    %424 = vector.broadcast %cst_134 : f32 to vector<8x32xf32>
    %425 = arith.mulf %424, %423 : vector<8x32xf32>
    %426 = arith.mulf %419, %376 : vector<8x32xf32>
    %427 = arith.mulf %414, %420 : vector<8x32xf32>
    %428 = arith.addf %426, %427 : vector<8x32xf32>
    %429 = math.tanh %428 : vector<8x32xf32>
    %430 = arith.mulf %425, %429 : vector<8x32xf32>
    %c0_135 = arith.constant 0 : index
    %c0_136 = arith.constant 0 : index
    %431 = vector.load %arg8[%c0_135, %c0_136] : memref<32x128xf32, #tpu.memory_space<vmem>>, vector<32x128xf32>
    %cst_137 = arith.constant dense<0.000000e+00> : vector<8x128xf32>
    %432 = tpu.matmul %430, %431, %cst_137 {dimension_numbers = #tpu.dot_dimension_numbers<[1], [0], [0], [1], [0, 0, 1, 1], [], []>} : vector<8x32xf32>, vector<32x128xf32>, vector<8x128xf32> -> vector<8x128xf32>
    %c0_138 = arith.constant 0 : index
    %c0_139 = arith.constant 0 : index
    %433 = vector.load %arg9[%c0_138, %c0_139] : memref<1x128xf32, #tpu.memory_space<vmem>>, vector<1x128xf32>
    %434 = vector.broadcast %433 : vector<1x128xf32> to vector<8x128xf32>
    %435 = arith.addf %432, %434 : vector<8x128xf32>
    %c0_140 = arith.constant 0 : index
    %c0_141 = arith.constant 0 : index
    %436 = vector.load %arg10[%c0_140, %c0_141] : memref<8x128xf32, #tpu.memory_space<vmem>>, vector<8x128xf32>
    tpu.vector_store %arg10[%c0_140, %c0_141], %435 {strides = array<i32>} : memref<8x128xf32, #tpu.memory_space<vmem>>, vector<8x128xf32>,
    return
  }
  func.func @transform_0(%arg0: i32) -> (i32, i32, i32) {
    %c0_i32 = arith.constant 0 : i32
    %c0_i32_0 = arith.constant 0 : i32
    %c0_i32_1 = arith.constant 0 : i32
    return %c0_i32, %arg0, %c0_i32_0 : i32, i32, i32
  }
  func.func @transform_1(%arg0: i32) -> (i32, i32) {
    %c0_i32 = arith.constant 0 : i32
    %c0_i32_0 = arith.constant 0 : i32
    %c0_i32_1 = arith.constant 0 : i32
    return %c0_i32, %c0_i32_0 : i32, i32
  }
  func.func @transform_2(%arg0: i32) -> (i32, i32) {
    %c0_i32 = arith.constant 0 : i32
    %c0_i32_0 = arith.constant 0 : i32
    %c0_i32_1 = arith.constant 0 : i32
    return %c0_i32, %c0_i32_0 : i32, i32
  }
  func.func @transform_3(%arg0: i32) -> (i32, i32) {
    %c0_i32 = arith.constant 0 : i32
    %c0_i32_0 = arith.constant 0 : i32
    %c0_i32_1 = arith.constant 0 : i32
    return %c0_i32, %c0_i32_0 : i32, i32
  }
  func.func @transform_4(%arg0: i32) -> (i32, i32) {
    %c0_i32 = arith.constant 0 : i32
    %c0_i32_0 = arith.constant 0 : i32
    %c0_i32_1 = arith.constant 0 : i32
    return %c0_i32, %c0_i32_0 : i32, i32
  }
  func.func @transform_5(%arg0: i32) -> (i32, i32) {
    %c0_i32 = arith.constant 0 : i32
    %c0_i32_0 = arith.constant 0 : i32
    %c0_i32_1 = arith.constant 0 : i32
    return %c0_i32, %c0_i32_0 : i32, i32
  }
  func.func @transform_6(%arg0: i32) -> (i32, i32) {
    %c0_i32 = arith.constant 0 : i32
    %c0_i32_0 = arith.constant 0 : i32
    %c0_i32_1 = arith.constant 0 : i32
    return %c0_i32, %c0_i32_0 : i32, i32
  }
  func.func @transform_7(%arg0: i32) -> (i32, i32) {
    %c0_i32 = arith.constant 0 : i32
    %c0_i32_0 = arith.constant 0 : i32
    %c0_i32_1 = arith.constant 0 : i32
    return %c0_i32, %c0_i32_0 : i32, i32
  }
  func.func @transform_8(%arg0: i32) -> (i32, i32) {
    %c0_i32 = arith.constant 0 : i32
    %c0_i32_0 = arith.constant 0 : i32
    %c0_i32_1 = arith.constant 0 : i32
    return %c0_i32, %c0_i32_0 : i32, i32
  }
  func.func @transform_9(%arg0: i32) -> (i32, i32) {
    %c0_i32 = arith.constant 0 : i32
    %c0_i32_0 = arith.constant 0 : i32
    return %arg0, %c0_i32 : i32, i32
  }
}

</mosaic_0001>

<bundles_post_ra>
// kernel: lstm_temporal_model.1
= control target key start
LH: loop header
LB: loop body
LE: loop exit
PB: predicated region body
PF: predicated region fallthrough
CT: control target
= control target key end

     0   :  { %14 = vsyncpa [#allocation3], 0  ;;  %s2963_s30 = smov [#allocation2]   ;;  %s3583_s0 = inlined_call_operand.vmem [shape: f32[8,8,16], index: 0, kind: input, shape index: {}]   ;;  %s3584_s1 = inlined_call_operand.vmem [shape: f32[16,128], index: 1, kind: input, shape index: {}]   ;;  %s3585_s2 = inlined_call_operand.vmem [shape: f32[32,128], index: 2, kind: input, shape index: {}]   ;;  %s3586_s3 = inlined_call_operand.vmem [shape: f32[1,128], index: 3, kind: input, shape index: {}]   ;;  %s3587_s4 = inlined_call_operand.vmem [shape: f32[32,128], index: 4, kind: input, shape index: {}]   ;;  %s3588_s5 = inlined_call_operand.vmem [shape: f32[32,128], index: 5, kind: input, shape index: {}]   ;;  %s3589_s6 = inlined_call_operand.vmem [shape: f32[1,128], index: 6, kind: input, shape index: {}]   ;;  %s3590_s7 = inlined_call_operand.hbm [shape: f32[32,128], index: 7, kind: input, shape index: {}]   ;;  %s3591_s8 = inlined_call_operand.vmem [shape: f32[1,128], index: 8, kind: input, shape index: {}]   ;;  %s3592_s9 = inlined_call_operand.vmem [shape: f32[8,128], index: 9, kind: output, shape index: {}]  }
   0x1   :  { %s34_s10 = sshll.u32 %s2963_s30, 4  ;;  %s35_s10 = int_to_ptr.vmem [resolvable:$true] %s34_s10 }
   0x2   :  { %s2949_s11 = scalar_lea.vmem %s35_s10, 512  ;;  %p2954_p1 = scmp.lt.s32.totalorder %s35_s10, %s35_s10 }
   0x3   :  { %p2950_p0 = scmp.ne.s32.totalorder %s35_s10, %s2949_s11  ;;  %p2955_p2 = scmp.lt.s32.totalorder %s2949_s11, %s2949_s11 }
   0x5   :  { %p2956_p3 = por %p2955_p2, %p2954_p1 }
   0x7   :  { %p2957_p4 = pnand %p2956_p3, %p2950_p0 }
   0x9   :  { %2960 = shalt.err (!%p2957_p4)
}
   0xa   :  { %s2964_s12 = smov 128   ;;  %s2965_s13 = smov 8  }
   0xb   :  { %40 = dma.hbm_to_vmem [thread:$0]  %s3590_s7, 512, %s35_s10, [#allocation3], %s2964_s12, %s2964_s12, %s2965_s13  }
   0xc   :  { %2961 = dma.done.wait [#allocation3], 512  }
   0xd   :  { %2962 = vsyncadd [#allocation3], 4294966784  ;;  %v2966_v0 = vmov 0.0   ;;  %vm2967_vm0 = vmmov 0   ;;  %v55_v1 = vld [vmem:[%s3584_s1 + $0x8] sm:$0xff]  ;;  %v3032_v2 = vld [vmem:[%s3585_s2 + $0x18] sm:$0xff] }
   0xe   :  { %2584 = vmatprep.subr.mxu1 %v2966_v0  ;;  %2592 = vmatprep.mubr.msk.f32.mxu1 %vm2967_vm0, %v2966_v0  ;;  %v54_v3 = vld [vmem:[%s3584_s1] sm:$0xff]  ;;  %v3041_v4 = vld [vmem:[%s3585_s2 + $0x10] sm:$0xff]  ;;  %vm63_vm1 = vcmask 130048   ;;  %v47_v6 = vld [vmem:[%s3583_s0 + $0x8] sm:$0xff]  ;;  %s2968_s11 = smov 64   ;;  %s2969_s12 = smov 32  }
   0xf   :  { %2568 = vmatprep.subr.mxu0 %v55_v1  ;;  %2585 = vmatpush3.msra.mxu1 %v3032_v2  ;;  %v46_v5 = vld [vmem:[%s3583_s0] sm:$0xff]  ;;  %v3054_v7 = vld [vmem:[%s3585_s2 + $0x8] sm:$0xff]  ;;  %v3088_v24 = vld [vmem:[%s3587_s4 + $0x18] sm:$0xff]  ;;  %vm212_vm2 = vcmask 261120  }
  0x10   :  { %2569 = vmatpush3.msra.mxu0 %v55_v1  ;;  %2586 = vmatprep.subr.mxu1 %v2966_v0  ;;  %v3062_v8 = vld [vmem:[%s3585_s2] sm:$0xff]  ;;  %v48_v25 = vld [vmem:[%s3583_s0 + $0x10] sm:$0xff]  ;;  %v3096_v26 = vld [vmem:[%s3588_s5 + $0x18] sm:$0xff] }
  0x11   :  { %2570 = vmatprep.subr.mxu0 %v54_v3  ;;  %2587 = vmatpush3.msra.mxu1 %v3041_v4  ;;  %v3077_v10 = vld [vmem:[%s3586_s3] ss:$0 sm:$0xff]  ;;  %v49_v27 = vld [vmem:[%s3583_s0 + $0x18] sm:$0xff]  ;;  %v3106_v28 = vld [vmem:[%s3588_s5 + $0x10] sm:$0xff] }
  0x12   :  { %2571 = vmatpush3.msra.mxu0 %v54_v3  ;;  %2572 = vmatprep.mubr.msk.f32.mxu0 %vm63_vm1, %v46_v5  ;;  %v3111_v29 = vld [vmem:[%s3587_s4 + $0x10] sm:$0xff]  ;;  %v50_v30 = vld [vmem:[%s3583_s0 + $0x20] sm:$0xff]  ;;  %v3123_v31 = vld [vmem:[%s3588_s5 + $0x8] sm:$0xff] }
  0x13   :  { %2588 = vmatprep.subr.mxu1 %v2966_v0  ;;  %2573 = vmatmul.mubr.msk.f32.vlgmr.msra.gmra.mxu0 %vm63_vm1, %v47_v6  ;;  %v51_v32 = vld [vmem:[%s3583_s0 + $0x28] sm:$0xff]  ;;  %v3135_v33 = vld [vmem:[%s3588_s5] sm:$0xff]  ;;  %v52_v35 = vld [vmem:[%s3583_s0 + $0x30] sm:$0xff] }
  0x14   :  { %2589 = vmatpush3.msra.mxu1 %v3054_v7  ;;  %2606 = vmatprep.subr.mxu0 %v2966_v0  ;;  %v3140_v34 = vld [vmem:[%s3587_s4 + $0x8] sm:$0xff]  ;;  %v53_v36 = vld [vmem:[%s3583_s0 + $0x38] sm:$0xff]  ;;  %v3161_v38 = vld [vmem:[%s3587_s4] sm:$0xff] }
  0x15   :  { %2590 = vmatprep.subr.mxu1 %v2966_v0  ;;  %2607 = vmatpush3.msra.mxu0 %v3088_v24  ;;  %v3219_v51 = vld [vmem:[%s3589_s6] ss:$0 sm:$0xff] }
  0x16   :  { %2591 = vmatpush3.msra.mxu1 %v3062_v8  ;;  %2575 = vmatprep.mubr.msk.f32.mxu0 %vm63_vm1, %v48_v25 }
  0x17   :  { %2593 = vmatmul.mubr.f32.vlgmr.msra.gmra.mxu1 %v2966_v0  ;;  %2595 = vmatprep.subr.mxu1 %v2966_v0 }
  0x18   :  { %2603 = vmatprep.mubr.msk.f32.mxu1 %vm2967_vm0, %v2966_v0  ;;  %2596 = vmatpush3.msra.mxu1 %v3096_v26 }
  0x19   :  { %2576 = vmatmul.mubr.msk.f32.gmra.mxu0 %vm63_vm1, %v49_v27  ;;  %2597 = vmatprep.subr.mxu1 %v2966_v0 }
  0x1a   :  { %2608 = vmatprep.subr.mxu0 %v2966_v0  ;;  %2598 = vmatpush3.msra.mxu1 %v3106_v28 }
  0x1b   :  { %2609 = vmatpush3.msra.mxu0 %v3111_v29  ;;  %2599 = vmatprep.subr.mxu1 %v2966_v0 }
  0x1c   :  { %2578 = vmatprep.mubr.msk.f32.mxu0 %vm63_vm1, %v50_v30  ;;  %2600 = vmatpush3.msra.mxu1 %v3123_v31 }
  0x1d   :  { %2579 = vmatmul.mubr.msk.f32.gmra.mxu0 %vm63_vm1, %v51_v32  ;;  %2601 = vmatprep.subr.mxu1 %v2966_v0 }
  0x1e   :  { %2610 = vmatprep.subr.mxu0 %v2966_v0  ;;  %2602 = vmatpush3.msra.mxu1 %v3135_v33 }
  0x1f   :  { %2611 = vmatpush3.msra.mxu0 %v3140_v34  ;;  %2617 = vmatprep.subr.mxu1 %v2966_v0 }
  0x20   :  { %2581 = vmatprep.mubr.msk.f32.mxu0 %vm63_vm1, %v52_v35  ;;  %2604 = vmatmul.mubr.f32.vlgmr.msra.gmra.mxu1 %v2966_v0 }
  0x21   :  { %2582 = vmatmul.mubr.msk.f32.gmra.mxu0 %vm63_vm1, %v53_v36  ;;  %2618 = vmatpush3.msra.mxu1 %v3032_v2 }
  0x22   :  { %2619 = vmatprep.subr.mxu1 %v2966_v0  ;;  %2612 = vmatprep.subr.mxu0 %v2966_v0 }
  0x23   :  { %2620 = vmatpush3.msra.mxu1 %v3041_v4  ;;  %2613 = vmatpush3.msra.mxu0 %v3161_v38 }
  0x24   :  { %2621 = vmatprep.subr.mxu1 %v2966_v0  ;;  %2614 = vmatprep.mubr.msk.f32.mxu0 %vm2967_vm0, %v2966_v0 }
  0x25   :  { %2622 = vmatpush3.msra.mxu1 %v3054_v7  ;;  %2625 = vmatprep.mubr.msk.f32.mxu1 %vm2967_vm0, %v2966_v0 }
  0x26   :  { %2623 = vmatprep.subr.mxu1 %v2966_v0  ;;  %2628 = vmatprep.subr.mxu0 %v2966_v0 }
  0x27   :  { %2624 = vmatpush3.msra.mxu1 %v3062_v8 }
  0x28   :  { %2639 = vmatprep.subr.mxu1 %v2966_v0 }
  0xd3   :  { %v3072_v9 = vpop.f32.mrf.mxu0 }
  0xd4   :  { %v160_v50 = vadd.f32 %v3072_v9, %v3077_v10 }
  0xd5   :  { %v154_v11 = vpop.f32.mrf.mxu0 }
  0xd6   :  { %v155_v12 = vadd.f32 %v3077_v10, %v154_v11 }
  0xd7   :  { %v282_v13 = vpop.f32.mrf.mxu1 }
  0xd8   :  { %v286_v14 = vadd.f32 %v282_v13, %v155_v12 }
  0xd9   :  { %v2594_v15 = vpop.f32.mrf.mxu1  ;;  %v3202_v44 = vpop.f32.mrf.mxu0 }
  0xda   :  { %2866 = vtanh.f32 %v286_v14 }
  0xdb   :  { %v3204_v45 = vpop.f32.mrf.mxu0 }
  0xdd   :  { %v3206_v46 = vpop.f32.mrf.mxu0 }
  0xdf   :  { %v3208_v47 = vpop.f32.mrf.mxu0 }
  0xe0   :  { %v373_v41 = vpop.f32.mrf.mxu1 }
  0xe1   :  { %v3210_v48 = vpop.f32.mrf.mxu0 }
  0xe2   :  { %v2605_v42 = vpop.f32.mrf.mxu1 }
  0xe3   :  { %v3212_v49 = vpop.f32.mrf.mxu0 }
  0xe7   :  { %v2867_v16 = vpop.eup %2866 }
  0xe8   :  { %292 = vrot.lane.b32.xlu0 %v2867_v16, %s2968_s11  ;;  %v288_v17 = vadd.f32 1.0, %v2867_v16 }
  0xea   :  { %v289_v18 = vmul.f32 0.5, %v288_v17 }
  0xec   :  { %v290_v21 = vmul.f32 0.0, %v289_v18 }
 0x15a   :  { %v293_v19 = vpop.permute.xlu0 %292 }
 0x15b   :  { %v295_v20 = vmul.f32 %v293_v19, %v289_v18 }
 0x15d   :  { %297 = vrot.lane.b32.xlu0 %v295_v20, %s2969_s12 }
 0x1cf   :  { %v298_v22 = vpop.permute.xlu0 %297 }
 0x1d0   :  { %v3082_v23 = vadd.f32 %v298_v22, %v290_v21 }
 0x1d2   :  { %2868 = vtanh.f32 %v3082_v23 }
 0x1df   :  { %v2869_v37 = vpop.eup %2868 }
 0x1e0   :  { %303 = vrot.lane.b32.xlu1 %v2869_v37, %s2968_s11 }
 0x252   :  { %v304_v39 = vpop.permute.xlu1 %303 }
 0x253   :  { %v306_v40 = vmul.f32 %v304_v39, %v289_v18  ;;  %v165_v39 = vadd.f32 %v3077_v10, %v3204_v45 }
 0x255   :  { %378 = vrot.lane.b32.xlu1 %v306_v40, %s2969_s12 }
 0x2c7   :  { %v379_v43 = vpop.permute.xlu1 %378 }
 0x2c8   :  { %2615 = vmatmul.mubr.msk.f32.vlgmr.msra.gmra.mxu0 %vm212_vm2, %v379_v43  ;;  %2626 = vmatmul.mubr.msk.f32.vlgmr.msra.gmra.mxu1 %vm212_vm2, %v379_v43 }
 0x2c9   :  { %2640 = vmatpush3.msra.mxu1 %v3088_v24  ;;  %2629 = vmatpush3.msra.mxu0 %v3096_v26 }
 0x2ca   :  { %2641 = vmatprep.subr.mxu1 %v2966_v0  ;;  %2630 = vmatprep.subr.mxu0 %v2966_v0 }
 0x2cb   :  { %2642 = vmatpush3.msra.mxu1 %v3111_v29  ;;  %2631 = vmatpush3.msra.mxu0 %v3106_v28 }
 0x2cc   :  { %2643 = vmatprep.subr.mxu1 %v2966_v0  ;;  %2632 = vmatprep.subr.mxu0 %v2966_v0 }
 0x2cd   :  { %2644 = vmatpush3.msra.mxu1 %v3140_v34  ;;  %2633 = vmatpush3.msra.mxu0 %v3123_v31 }
 0x2ce   :  { %2645 = vmatprep.subr.mxu1 %v2966_v0  ;;  %2647 = vmatprep.mubr.msk.f32.mxu1 %vm2967_vm0, %v2966_v0 }
 0x2cf   :  { %2646 = vmatpush3.msra.mxu1 %v3161_v38  ;;  %2634 = vmatprep.subr.mxu0 %v2966_v0 }
 0x2d0   :  { %2635 = vmatpush3.msra.mxu0 %v3135_v33  ;;  %2636 = vmatprep.mubr.msk.f32.mxu0 %vm2967_vm0, %v2966_v0 }
 0x2d1   :  { %2650 = vmatprep.subr.mxu0 %v2966_v0  ;;  %2661 = vmatprep.subr.mxu1 %v2966_v0 }
 0x388   :  { %v448_v52 = vpop.f32.mrf.mxu0  ;;  %v539_v53 = vpop.f32.mrf.mxu1 }
 0x389   :  { %v449_v54 = vadd.f32 %v448_v52, %v373_v41  ;;  %v543_v55 = vadd.f32 %v539_v53, %v160_v50 }
 0x38a   :  { %v2616_v56 = vpop.f32.mrf.mxu0  ;;  %v2627_v57 = vpop.f32.mrf.mxu1 }
 0x38b   :  { %v452_v58 = vadd.f32 %v3219_v51, %v449_v54  ;;  %2870 = vtanh.f32 %v543_v55 }
 0x38d   :  { %2872 = vtanh.f32 %v452_v58 }
 0x398   :  { %v2871_v59 = vpop.eup %2870 }
 0x399   :  { %549 = vrot.lane.b32.xlu1 %v2871_v59, %s2968_s11  ;;  %v545_v61 = vadd.f32 1.0, %v2871_v59 }
 0x39a   :  { %v2873_v60 = vpop.eup %2872 }
 0x39b   :  { %458 = vrot.lane.b32.xlu0 %v2873_v60, %s2968_s11  ;;  %v454_v62 = vadd.f32 1.0, %v2873_v60  ;;  %v546_v63 = vmul.f32 0.5, %v545_v61 }
 0x39d   :  { %v455_v5 = vmul.f32 0.5, %v454_v62  ;;  %v547_v11 = vmul.f32 %v546_v63, %v3082_v23 }
 0x39f   :  { %v456_v14 = vmul.f32 0.0, %v455_v5 }
 0x40b   :  { %v550_v1 = vpop.permute.xlu1 %549 }
 0x40c   :  { %v552_v3 = vmul.f32 %v550_v1, %v546_v63 }
 0x40d   :  { %v459_v6 = vpop.permute.xlu0 %458 }
 0x40e   :  { %v461_v9 = vmul.f32 %v459_v6, %v455_v5  ;;  %554 = vrot.lane.b32.xlu1 %v552_v3, %s2969_s12 }
 0x410   :  { %463 = vrot.lane.b32.xlu0 %v461_v9, %s2969_s12 }
 0x480   :  { %v555_v12 = vpop.permute.xlu1 %554 }
 0x481   :  { %v3227_v13 = vadd.f32 %v555_v12, %v547_v11 }
 0x482   :  { %v464_v15 = vpop.permute.xlu0 %463 }
 0x483   :  { %2874 = vtanh.f32 %v3227_v13  ;;  %v3230_v16 = vadd.f32 %v464_v15, %v456_v14 }
 0x485   :  { %2876 = vtanh.f32 %v3230_v16 }
 0x490   :  { %v2875_v17 = vpop.eup %2874 }
 0x491   :  { %560 = vrot.lane.b32.xlu1 %v2875_v17, %s2968_s11 }
 0x492   :  { %v2877_v18 = vpop.eup %2876 }
 0x493   :  { %469 = vrot.lane.b32.xlu0 %v2877_v18, %s2968_s11  ;;  %v170_v18 = vadd.f32 %v3202_v44, %v3077_v10 }
 0x503   :  { %v561_v19 = vpop.permute.xlu1 %560 }
 0x504   :  { %v563_v20 = vmul.f32 %v561_v19, %v546_v63 }
 0x505   :  { %v470_v21 = vpop.permute.xlu0 %469 }
 0x506   :  { %v472_v22 = vmul.f32 %v470_v21, %v455_v5  ;;  %640 = vrot.lane.b32.xlu1 %v563_v20, %s2969_s12 }
 0x508   :  { %565 = vrot.lane.b32.xlu0 %v472_v22, %s2969_s12 }
 0x578   :  { %v641_v23 = vpop.permute.xlu1 %640 }
 0x579   :  { %2648 = vmatmul.mubr.msk.f32.vlgmr.msra.gmra.mxu1 %vm212_vm2, %v641_v23 }
 0x57a   :  { %v566_v25 = vpop.permute.xlu0 %565  ;;  %2662 = vmatpush3.msra.mxu1 %v3096_v26  ;;  %2669 = vmatprep.mubr.msk.f32.mxu1 %vm2967_vm0, %v2966_v0 }
 0x57b   :  { %2637 = vmatmul.mubr.msk.f32.vlgmr.msra.gmra.mxu0 %vm212_vm2, %v566_v25  ;;  %2663 = vmatprep.subr.mxu1 %v2966_v0 }
 0x57c   :  { %2651 = vmatpush3.msra.mxu0 %v3032_v2  ;;  %2658 = vmatprep.mubr.msk.f32.mxu0 %vm2967_vm0, %v2966_v0 }
 0x57d   :  { %2652 = vmatprep.subr.mxu0 %v2966_v0  ;;  %2664 = vmatpush3.msra.mxu1 %v3106_v28 }
 0x57e   :  { %2653 = vmatpush3.msra.mxu0 %v3041_v4  ;;  %2665 = vmatprep.subr.mxu1 %v2966_v0 }
 0x57f   :  { %2654 = vmatprep.subr.mxu0 %v2966_v0  ;;  %2666 = vmatpush3.msra.mxu1 %v3123_v31 }
 0x580   :  { %2655 = vmatpush3.msra.mxu0 %v3054_v7  ;;  %2667 = vmatprep.subr.mxu1 %v2966_v0 }
 0x581   :  { %2656 = vmatprep.subr.mxu0 %v2966_v0  ;;  %2668 = vmatpush3.msra.mxu1 %v3135_v33 }
 0x582   :  { %2657 = vmatpush3.msra.mxu0 %v3062_v8  ;;  %2683 = vmatprep.subr.mxu1 %v2966_v0 }
 0x583   :  { %2659 = vmatmul.mubr.msk.f32.vlgmr.msra.gmra.mxu0 %vm212_vm2, %v641_v23  ;;  %2672 = vmatprep.subr.mxu0 %v2966_v0 }
 0x584   :  { %2673 = vmatpush3.msra.mxu0 %v3088_v24  ;;  %2680 = vmatprep.mubr.msk.f32.mxu0 %vm2967_vm0, %v2966_v0 }
 0x585   :  { %2674 = vmatprep.subr.mxu0 %v2966_v0 }
 0x586   :  { %2675 = vmatpush3.msra.mxu0 %v3111_v29 }
 0x587   :  { %2676 = vmatprep.subr.mxu0 %v2966_v0 }
 0x588   :  { %2677 = vmatpush3.msra.mxu0 %v3140_v34 }
 0x589   :  { %2678 = vmatprep.subr.mxu0 %v2966_v0 }
 0x58a   :  { %2679 = vmatpush3.msra.mxu0 %v3161_v38 }
 0x58b   :  { %2694 = vmatprep.subr.mxu0 %v2966_v0 }
 0x639   :  { %v710_v27 = vpop.f32.mrf.mxu1 }
 0x63b   :  { %v635_v30 = vpop.f32.mrf.mxu0  ;;  %v2649_v32 = vpop.f32.mrf.mxu1 }
 0x63c   :  { %v711_v35 = vadd.f32 %v710_v27, %v635_v30 }
 0x63d   :  { %v2638_v36 = vpop.f32.mrf.mxu0 }
 0x63e   :  { %v714_v37 = vadd.f32 %v3219_v51, %v711_v35 }
 0x640   :  { %2878 = vtanh.f32 %v714_v37 }
 0x643   :  { %v801_v40 = vpop.f32.mrf.mxu0 }
 0x644   :  { %v805_v41 = vadd.f32 %v801_v40, %v165_v39 }
 0x645   :  { %v2660_v42 = vpop.f32.mrf.mxu0 }
 0x646   :  { %2880 = vtanh.f32 %v805_v41 }
 0x64d   :  { %v2879_v43 = vpop.eup %2878 }
 0x64e   :  { %720 = vrot.lane.b32.xlu0 %v2879_v43, %s2968_s11  ;;  %v716_v52 = vadd.f32 1.0, %v2879_v43 }
 0x650   :  { %v717_v53 = vmul.f32 0.5, %v716_v52 }
 0x652   :  { %v718_v59 = vmul.f32 %v717_v53, %v3230_v16 }
 0x653   :  { %v2881_v50 = vpop.eup %2880 }
 0x654   :  { %811 = vrot.lane.b32.xlu1 %v2881_v50, %s2968_s11  ;;  %v807_v56 = vadd.f32 1.0, %v2881_v50 }
 0x656   :  { %v808_v57 = vmul.f32 0.5, %v807_v56 }
 0x658   :  { %v809_v62 = vmul.f32 %v808_v57, %v3227_v13 }
 0x6c0   :  { %v721_v54 = vpop.permute.xlu0 %720 }
 0x6c1   :  { %v723_v55 = vmul.f32 %v721_v54, %v717_v53 }
 0x6c3   :  { %725 = vrot.lane.b32.xlu0 %v723_v55, %s2969_s12 }
 0x6c6   :  { %v812_v58 = vpop.permute.xlu1 %811 }
 0x6c7   :  { %v814_v45 = vmul.f32 %v812_v58, %v808_v57 }
 0x6c9   :  { %816 = vrot.lane.b32.xlu1 %v814_v45, %s2969_s12 }
 0x735   :  { %v726_v60 = vpop.permute.xlu0 %725 }
 0x736   :  { %v3278_v61 = vadd.f32 %v726_v60, %v718_v59 }
 0x738   :  { %2882 = vtanh.f32 %v3278_v61 }
 0x73b   :  { %v817_v63 = vpop.permute.xlu1 %816 }
 0x73c   :  { %v3282_v1 = vadd.f32 %v817_v63, %v809_v62 }
 0x73e   :  { %2884 = vtanh.f32 %v3282_v1 }
 0x745   :  { %v2883_v3 = vpop.eup %2882 }
 0x746   :  { %731 = vrot.lane.b32.xlu0 %v2883_v3, %s2968_s11 }
 0x74b   :  { %v2885_v5 = vpop.eup %2884 }
 0x74c   :  { %822 = vrot.lane.b32.xlu1 %v2885_v5, %s2968_s11 }
 0x7b8   :  { %v732_v6 = vpop.permute.xlu0 %731 }
 0x7b9   :  { %v734_v9 = vmul.f32 %v732_v6, %v717_v53 }
 0x7bb   :  { %827 = vrot.lane.b32.xlu0 %v734_v9, %s2969_s12  ;;  %v175_v9 = vadd.f32 %v3077_v10, %v3208_v47 }
 0x7be   :  { %v823_v11 = vpop.permute.xlu1 %822 }
 0x7bf   :  { %v825_v12 = vmul.f32 %v823_v11, %v808_v57 }
 0x7c1   :  { %902 = vrot.lane.b32.xlu1 %v825_v12, %s2969_s12 }
 0x82d   :  { %v828_v13 = vpop.permute.xlu0 %827 }
 0x82e   :  { %2670 = vmatmul.mubr.msk.f32.vlgmr.msra.gmra.mxu1 %vm212_vm2, %v828_v13 }
 0x82f   :  { %2684 = vmatpush3.msra.mxu1 %v3032_v2  ;;  %2691 = vmatprep.mubr.msk.f32.mxu1 %vm2967_vm0, %v2966_v0 }
 0x830   :  { %2685 = vmatprep.subr.mxu1 %v2966_v0 }
 0x831   :  { %2686 = vmatpush3.msra.mxu1 %v3041_v4 }
 0x832   :  { %2687 = vmatprep.subr.mxu1 %v2966_v0 }
 0x833   :  { %2688 = vmatpush3.msra.mxu1 %v3054_v7  ;;  %v903_v14 = vpop.permute.xlu1 %902 }
 0x834   :  { %2681 = vmatmul.mubr.msk.f32.vlgmr.msra.gmra.mxu0 %vm212_vm2, %v903_v14  ;;  %2689 = vmatprep.subr.mxu1 %v2966_v0 }
 0x835   :  { %2690 = vmatpush3.msra.mxu1 %v3062_v8  ;;  %2695 = vmatpush3.msra.mxu0 %v3096_v26 }
 0x836   :  { %2692 = vmatmul.mubr.msk.f32.vlgmr.msra.gmra.mxu1 %vm212_vm2, %v903_v14  ;;  %2705 = vmatprep.subr.mxu1 %v2966_v0 }
 0x837   :  { %2696 = vmatprep.subr.mxu0 %v2966_v0  ;;  %2706 = vmatpush3.msra.mxu1 %v3088_v24 }
 0x838   :  { %2697 = vmatpush3.msra.mxu0 %v3106_v28  ;;  %2707 = vmatprep.subr.mxu1 %v2966_v0 }
 0x839   :  { %2698 = vmatprep.subr.mxu0 %v2966_v0  ;;  %2708 = vmatpush3.msra.mxu1 %v3111_v29 }
 0x83a   :  { %2699 = vmatpush3.msra.mxu0 %v3123_v31  ;;  %2709 = vmatprep.subr.mxu1 %v2966_v0 }
 0x83b   :  { %2700 = vmatprep.subr.mxu0 %v2966_v0  ;;  %2710 = vmatpush3.msra.mxu1 %v3140_v34 }
 0x83c   :  { %2701 = vmatpush3.msra.mxu0 %v3135_v33  ;;  %2711 = vmatprep.subr.mxu1 %v2966_v0 }
 0x83d   :  { %2712 = vmatpush3.msra.mxu1 %v3161_v38  ;;  %2713 = vmatprep.mubr.msk.f32.mxu1 %vm2967_vm0, %v2966_v0 }
 0x83e   :  { %2702 = vmatprep.mubr.msk.f32.mxu0 %vm2967_vm0, %v2966_v0  ;;  %2716 = vmatprep.subr.mxu0 %v2966_v0 }
 0x83f   :  { %2727 = vmatprep.subr.mxu1 %v2966_v0 }
 0x8ee   :  { %v897_v15 = vpop.f32.mrf.mxu1 }
 0x8f0   :  { %v2671_v16 = vpop.f32.mrf.mxu1 }
 0x8f4   :  { %v972_v17 = vpop.f32.mrf.mxu0 }
 0x8f5   :  { %v973_v19 = vadd.f32 %v972_v17, %v897_v15 }
 0x8f6   :  { %v2682_v20 = vpop.f32.mrf.mxu0  ;;  %v1063_v21 = vpop.f32.mrf.mxu1 }
 0x8f7   :  { %v976_v22 = vadd.f32 %v3219_v51, %v973_v19  ;;  %v1067_v23 = vadd.f32 %v1063_v21, %v170_v18 }
 0x8f8   :  { %v2693_v25 = vpop.f32.mrf.mxu1 }
 0x8f9   :  { %2886 = vtanh.f32 %v976_v22 }
 0x8fa   :  { %2888 = vtanh.f32 %v1067_v23 }
 0x906   :  { %v2887_v27 = vpop.eup %2886 }
 0x907   :  { %v2889_v30 = vpop.eup %2888  ;;  %982 = vrot.lane.b32.xlu0 %v2887_v27, %s2968_s11  ;;  %v978_v32 = vadd.f32 1.0, %v2887_v27 }
 0x908   :  { %1073 = vrot.lane.b32.xlu1 %v2889_v30, %s2968_s11  ;;  %v1069_v35 = vadd.f32 1.0, %v2889_v30 }
 0x909   :  { %v979_v36 = vmul.f32 0.5, %v978_v32 }
 0x90a   :  { %v1070_v37 = vmul.f32 0.5, %v1069_v35 }
 0x90b   :  { %v980_v42 = vmul.f32 %v979_v36, %v3278_v61 }
 0x90c   :  { %v1071_v43 = vmul.f32 %v1070_v37, %v3282_v1 }
 0x979   :  { %v983_v44 = vpop.permute.xlu0 %982 }
 0x97a   :  { %v1074_v39 = vpop.permute.xlu1 %1073  ;;  %v985_v40 = vmul.f32 %v983_v44, %v979_v36 }
 0x97b   :  { %v1076_v41 = vmul.f32 %v1074_v39, %v1070_v37 }
 0x97c   :  { %987 = vrot.lane.b32.xlu0 %v985_v40, %s2969_s12 }
 0x97d   :  { %1078 = vrot.lane.b32.xlu1 %v1076_v41, %s2969_s12 }
 0x9ee   :  { %v988_v50 = vpop.permute.xlu0 %987 }
 0x9ef   :  { %v1079_v52 = vpop.permute.xlu1 %1078  ;;  %v3331_v53 = vadd.f32 %v988_v50, %v980_v42 }
 0x9f0   :  { %v3333_v54 = vadd.f32 %v1079_v52, %v1071_v43 }
 0x9f1   :  { %2890 = vtanh.f32 %v3331_v53 }
 0x9f2   :  { %2892 = vtanh.f32 %v3333_v54 }
 0x9fe   :  { %v2891_v55 = vpop.eup %2890 }
 0x9ff   :  { %v2893_v56 = vpop.eup %2892  ;;  %993 = vrot.lane.b32.xlu0 %v2891_v55, %s2968_s11  ;;  %v180_v55 = vadd.f32 %v3206_v46, %v3077_v10 }
 0xa00   :  { %1084 = vrot.lane.b32.xlu1 %v2893_v56, %s2968_s11 }
 0xa71   :  { %v994_v57 = vpop.permute.xlu0 %993 }
 0xa72   :  { %v1085_v58 = vpop.permute.xlu1 %1084  ;;  %v996_v45 = vmul.f32 %v994_v57, %v979_v36 }
 0xa73   :  { %v1087_v59 = vmul.f32 %v1085_v58, %v1070_v37 }
 0xa74   :  { %1089 = vrot.lane.b32.xlu0 %v996_v45, %s2969_s12 }
 0xa75   :  { %1164 = vrot.lane.b32.xlu1 %v1087_v59, %s2969_s12 }
 0xae6   :  { %v1090_v60 = vpop.permute.xlu0 %1089 }
 0xae7   :  { %v1165_v61 = vpop.permute.xlu1 %1164  ;;  %2703 = vmatmul.mubr.msk.f32.vlgmr.msra.gmra.mxu0 %vm212_vm2, %v1090_v60 }
 0xae8   :  { %2714 = vmatmul.mubr.msk.f32.vlgmr.msra.gmra.mxu1 %vm212_vm2, %v1165_v61  ;;  %2717 = vmatpush3.msra.mxu0 %v3032_v2 }
 0xae9   :  { %2718 = vmatprep.subr.mxu0 %v2966_v0  ;;  %2724 = vmatprep.mubr.msk.f32.mxu0 %vm2967_vm0, %v2966_v0 }
 0xaea   :  { %2719 = vmatpush3.msra.mxu0 %v3041_v4  ;;  %2728 = vmatpush3.msra.mxu1 %v3096_v26 }
 0xaeb   :  { %2720 = vmatprep.subr.mxu0 %v2966_v0  ;;  %2729 = vmatprep.subr.mxu1 %v2966_v0 }
 0xaec   :  { %2721 = vmatpush3.msra.mxu0 %v3054_v7  ;;  %2730 = vmatpush3.msra.mxu1 %v3106_v28 }
 0xaed   :  { %2722 = vmatprep.subr.mxu0 %v2966_v0  ;;  %2731 = vmatprep.subr.mxu1 %v2966_v0 }
 0xaee   :  { %2723 = vmatpush3.msra.mxu0 %v3062_v8  ;;  %2732 = vmatpush3.msra.mxu1 %v3123_v31 }
 0xaef   :  { %2725 = vmatmul.mubr.msk.f32.vlgmr.msra.gmra.mxu0 %vm212_vm2, %v1165_v61  ;;  %2733 = vmatprep.subr.mxu1 %v2966_v0 }
 0xaf0   :  { %2738 = vmatprep.subr.mxu0 %v2966_v0  ;;  %2734 = vmatpush3.msra.mxu1 %v3135_v33 }
 0xaf1   :  { %2739 = vmatpush3.msra.mxu0 %v3088_v24  ;;  %2735 = vmatprep.mubr.msk.f32.mxu1 %vm2967_vm0, %v2966_v0 }
 0xaf2   :  { %2740 = vmatprep.subr.mxu0 %v2966_v0  ;;  %2749 = vmatprep.subr.mxu1 %v2966_v0 }
 0xaf3   :  { %2741 = vmatpush3.msra.mxu0 %v3111_v29  ;;  %2746 = vmatprep.mubr.msk.f32.mxu0 %vm2967_vm0, %v2966_v0 }
 0xaf4   :  { %2742 = vmatprep.subr.mxu0 %v2966_v0 }
 0xaf5   :  { %2743 = vmatpush3.msra.mxu0 %v3140_v34 }
 0xaf6   :  { %2744 = vmatprep.subr.mxu0 %v2966_v0 }
 0xaf7   :  { %2745 = vmatpush3.msra.mxu0 %v3161_v38 }
 0xaf8   :  { %2760 = vmatprep.subr.mxu0 %v2966_v0 }
 0xba7   :  { %v1159_v62 = vpop.f32.mrf.mxu0 }
 0xba8   :  { %v1234_v63 = vpop.f32.mrf.mxu1 }
 0xba9   :  { %v1235_v1 = vadd.f32 %v1234_v63, %v1159_v62  ;;  %v2704_v3 = vpop.f32.mrf.mxu0 }
 0xbaa   :  { %v2715_v5 = vpop.f32.mrf.mxu1 }
 0xbab   :  { %v1238_v6 = vadd.f32 %v3219_v51, %v1235_v1 }
 0xbad   :  { %2894 = vtanh.f32 %v1238_v6 }
 0xbaf   :  { %v1325_v11 = vpop.f32.mrf.mxu0 }
 0xbb0   :  { %v1329_v12 = vadd.f32 %v1325_v11, %v175_v9 }
 0xbb1   :  { %v2726_v13 = vpop.f32.mrf.mxu0 }
 0xbb2   :  { %2896 = vtanh.f32 %v1329_v12 }
 0xbba   :  { %v2895_v14 = vpop.eup %2894 }
 0xbbb   :  { %1244 = vrot.lane.b32.xlu0 %v2895_v14, %s2968_s11  ;;  %v1240_v16 = vadd.f32 1.0, %v2895_v14 }
 0xbbd   :  { %v1241_v17 = vmul.f32 0.5, %v1240_v16 }
 0xbbf   :  { %v2897_v15 = vpop.eup %2896  ;;  %v1242_v23 = vmul.f32 %v1241_v17, %v3331_v53 }
 0xbc0   :  { %1335 = vrot.lane.b32.xlu1 %v2897_v15, %s2968_s11  ;;  %v1331_v19 = vadd.f32 1.0, %v2897_v15 }
 0xbc2   :  { %v1332_v21 = vmul.f32 0.5, %v1331_v19 }
 0xbc4   :  { %v1333_v30 = vmul.f32 %v1332_v21, %v3333_v54 }
 0xc2d   :  { %v1245_v18 = vpop.permute.xlu0 %1244 }
 0xc2e   :  { %v1247_v20 = vmul.f32 %v1245_v18, %v1241_v17 }
 0xc30   :  { %1249 = vrot.lane.b32.xlu0 %v1247_v20, %s2969_s12 }
 0xc32   :  { %v1336_v22 = vpop.permute.xlu1 %1335 }
 0xc33   :  { %v1338_v47 = vmul.f32 %v1336_v22, %v1332_v21 }
 0xc35   :  { %1340 = vrot.lane.b32.xlu1 %v1338_v47, %s2969_s12 }
 0xca2   :  { %v1250_v25 = vpop.permute.xlu0 %1249 }
 0xca3   :  { %v3382_v27 = vadd.f32 %v1250_v25, %v1242_v23 }
 0xca5   :  { %2898 = vtanh.f32 %v3382_v27 }
 0xca7   :  { %v1341_v32 = vpop.permute.xlu1 %1340 }
 0xca8   :  { %v3386_v35 = vadd.f32 %v1341_v32, %v1333_v30 }
 0xcaa   :  { %2900 = vtanh.f32 %v3386_v35 }
 0xcb2   :  { %v2899_v36 = vpop.eup %2898 }
 0xcb3   :  { %1255 = vrot.lane.b32.xlu0 %v2899_v36, %s2968_s11 }
 0xcb7   :  { %v2901_v37 = vpop.eup %2900 }
 0xcb8   :  { %1346 = vrot.lane.b32.xlu1 %v2901_v37, %s2968_s11 }
 0xd25   :  { %v1256_v44 = vpop.permute.xlu0 %1255 }
 0xd26   :  { %v1258_v39 = vmul.f32 %v1256_v44, %v1241_v17 }
 0xd28   :  { %1351 = vrot.lane.b32.xlu0 %v1258_v39, %s2969_s12 }
 0xd2a   :  { %v1347_v40 = vpop.permute.xlu1 %1346 }
 0xd2b   :  { %v1349_v41 = vmul.f32 %v1347_v40, %v1332_v21 }
 0xd2d   :  { %1426 = vrot.lane.b32.xlu1 %v1349_v41, %s2969_s12 }
 0xd9a   :  { %v1352_v42 = vpop.permute.xlu0 %1351 }
 0xd9b   :  { %2736 = vmatmul.mubr.msk.f32.vlgmr.msra.gmra.mxu1 %vm212_vm2, %v1352_v42 }
 0xd9c   :  { %2750 = vmatpush3.msra.mxu1 %v3032_v2  ;;  %2757 = vmatprep.mubr.msk.f32.mxu1 %vm2967_vm0, %v2966_v0 }
 0xd9d   :  { %2751 = vmatprep.subr.mxu1 %v2966_v0 }
 0xd9e   :  { %2752 = vmatpush3.msra.mxu1 %v3041_v4 }
 0xd9f   :  { %2753 = vmatprep.subr.mxu1 %v2966_v0  ;;  %v1427_v43 = vpop.permute.xlu1 %1426 }
 0xda0   :  { %2754 = vmatpush3.msra.mxu1 %v3054_v7  ;;  %2747 = vmatmul.mubr.msk.f32.vlgmr.msra.gmra.mxu0 %vm212_vm2, %v1427_v43 }
 0xda1   :  { %2755 = vmatprep.subr.mxu1 %v2966_v0  ;;  %2761 = vmatpush3.msra.mxu0 %v3096_v26 }
 0xda2   :  { %2756 = vmatpush3.msra.mxu1 %v3062_v8  ;;  %2762 = vmatprep.subr.mxu0 %v2966_v0 }
 0xda3   :  { %2758 = vmatmul.mubr.msk.f32.vlgmr.msra.gmra.mxu1 %vm212_vm2, %v1427_v43  ;;  %2771 = vmatprep.subr.mxu1 %v2966_v0 }
 0xda4   :  { %2772 = vmatpush3.msra.mxu1 %v3088_v24  ;;  %2763 = vmatpush3.msra.mxu0 %v3106_v28 }
 0xda5   :  { %2773 = vmatprep.subr.mxu1 %v2966_v0  ;;  %2764 = vmatprep.subr.mxu0 %v2966_v0 }
 0xda6   :  { %2774 = vmatpush3.msra.mxu1 %v3111_v29  ;;  %2765 = vmatpush3.msra.mxu0 %v3123_v31 }
 0xda7   :  { %2775 = vmatprep.subr.mxu1 %v2966_v0  ;;  %2766 = vmatprep.subr.mxu0 %v2966_v0 }
 0xda8   :  { %2776 = vmatpush3.msra.mxu1 %v3140_v34  ;;  %2767 = vmatpush3.msra.mxu0 %v3135_v33 }
 0xda9   :  { %2777 = vmatprep.subr.mxu1 %v2966_v0  ;;  %2779 = vmatprep.mubr.msk.f32.mxu1 %vm2967_vm0, %v2966_v0 }
 0xdaa   :  { %2778 = vmatpush3.msra.mxu1 %v3161_v38  ;;  %2768 = vmatprep.mubr.msk.f32.mxu0 %vm2967_vm0, %v2966_v0 }
 0xdab   :  { %2782 = vmatprep.subr.mxu0 %v2966_v0  ;;  %2793 = vmatprep.subr.mxu1 %v2966_v0 }
 0xe5b   :  { %v1421_v50 = vpop.f32.mrf.mxu1 }
 0xe5d   :  { %v2737_v52 = vpop.f32.mrf.mxu1 }
 0xe60   :  { %v1496_v53 = vpop.f32.mrf.mxu0 }
 0xe61   :  { %v1497_v54 = vadd.f32 %v1496_v53, %v1421_v50 }
 0xe62   :  { %v2748_v56 = vpop.f32.mrf.mxu0 }
 0xe63   :  { %v1500_v57 = vadd.f32 %v3219_v51, %v1497_v54  ;;  %v1587_v58 = vpop.f32.mrf.mxu1 }
 0xe64   :  { %v1591_v45 = vadd.f32 %v1587_v58, %v180_v55 }
 0xe65   :  { %2902 = vtanh.f32 %v1500_v57  ;;  %v2759_v59 = vpop.f32.mrf.mxu1 }
 0xe66   :  { %2904 = vtanh.f32 %v1591_v45  ;;  %v2930_v45 = vld [vmem:[%s3585_s2 + $0x18] sm:$0xff]  ;;  %v2931_v59 = vld [vmem:[%s3585_s2 + $0x10] sm:$0xff] }
 0xe72   :  { %v2903_v60 = vpop.eup %2902 }
 0xe73   :  { %v2905_v61 = vpop.eup %2904  ;;  %1506 = vrot.lane.b32.xlu0 %v2903_v60, %s2968_s11  ;;  %v1502_v62 = vadd.f32 1.0, %v2903_v60 }
 0xe74   :  { %1597 = vrot.lane.b32.xlu1 %v2905_v61, %s2968_s11  ;;  %v1593_v63 = vadd.f32 1.0, %v2905_v61  ;;  %v2932_v61 = vld [vmem:[%s3585_s2 + $0x8] sm:$0xff] }
 0xe75   :  { %v1503_v1 = vmul.f32 0.5, %v1502_v62  ;;  %v2933_v62 = vld [vmem:[%s3588_s5 + $0x18] sm:$0xff] }
 0xe76   :  { %v1594_v3 = vmul.f32 0.5, %v1593_v63  ;;  %v2934_v63 = vld [vmem:[%s3585_s2] sm:$0xff] }
 0xe77   :  { %v1504_v11 = vmul.f32 %v1503_v1, %v3382_v27 }
 0xe78   :  { %v1595_v12 = vmul.f32 %v1594_v3, %v3386_v35 }
 0xee5   :  { %v1507_v5 = vpop.permute.xlu0 %1506 }
 0xee6   :  { %v1598_v46 = vpop.permute.xlu1 %1597  ;;  %v1509_v6 = vmul.f32 %v1507_v5, %v1503_v1  ;;  %v2937_v5 = vld [vmem:[%s3587_s4 + $0x10] sm:$0xff] }
 0xee7   :  { %v1600_v9 = vmul.f32 %v1598_v46, %v1594_v3  ;;  %v2938_v46 = vld [vmem:[%s3588_s5 + $0x8] sm:$0xff] }
 0xee8   :  { %1511 = vrot.lane.b32.xlu0 %v1509_v6, %s2969_s12  ;;  %v2939_v6 = vld [vmem:[%s3588_s5] sm:$0xff] }
 0xee9   :  { %1602 = vrot.lane.b32.xlu1 %v1600_v9, %s2969_s12 }
 0xf5a   :  { %v1512_v13 = vpop.permute.xlu0 %1511 }
 0xf5b   :  { %v1603_v14 = vpop.permute.xlu1 %1602  ;;  %v3435_v15 = vadd.f32 %v1512_v13, %v1504_v11  ;;  %v2940_v13 = vld [vmem:[%s3586_s3] ss:$0 sm:$0xff] }
 0xf5c   :  { %v3437_v16 = vadd.f32 %v1603_v14, %v1595_v12  ;;  %v190_v14 = vadd.f32 %v2940_v13, %v3210_v48 }
 0xf5d   :  { %2906 = vtanh.f32 %v3435_v15 }
 0xf5e   :  { %2908 = vtanh.f32 %v3437_v16 }
 0xf6a   :  { %v2907_v17 = vpop.eup %2906 }
 0xf6b   :  { %v2909_v18 = vpop.eup %2908  ;;  %1517 = vrot.lane.b32.xlu0 %v2907_v17, %s2968_s11 }
 0xf6c   :  { %1608 = vrot.lane.b32.xlu1 %v2909_v18, %s2968_s11 }
 0xfdd   :  { %v1518_v19 = vpop.permute.xlu0 %1517 }
 0xfde   :  { %v1609_v20 = vpop.permute.xlu1 %1608  ;;  %v1520_v21 = vmul.f32 %v1518_v19, %v1503_v1  ;;  %v2935_v1 = vld [vmem:[%s3587_s4 + $0x18] sm:$0xff] }
 0xfdf   :  { %v1611_v22 = vmul.f32 %v1609_v20, %v1594_v3  ;;  %v2936_v3 = vld [vmem:[%s3588_s5 + $0x10] sm:$0xff] }
 0xfe0   :  { %1613 = vrot.lane.b32.xlu0 %v1520_v21, %s2969_s12 }
 0xfe1   :  { %1688 = vrot.lane.b32.xlu1 %v1611_v22, %s2969_s12 }
0x1052   :  { %v1614_v47 = vpop.permute.xlu0 %1613 }
0x1053   :  { %v1689_v23 = vpop.permute.xlu1 %1688  ;;  %2769 = vmatmul.mubr.msk.f32.vlgmr.msra.gmra.mxu0 %vm212_vm2, %v1614_v47 }
0x1054   :  { %2780 = vmatmul.mubr.msk.f32.vlgmr.msra.gmra.mxu1 %vm212_vm2, %v1689_v23  ;;  %2783 = vmatpush3.msra.mxu0 %v3032_v2 }
0x1055   :  { %2784 = vmatprep.subr.mxu0 %v2966_v0  ;;  %2790 = vmatprep.mubr.msk.f32.mxu0 %vm2967_vm0, %v2966_v0 }
0x1056   :  { %2785 = vmatpush3.msra.mxu0 %v3041_v4  ;;  %2794 = vmatpush3.msra.mxu1 %v3096_v26 }
0x1057   :  { %2786 = vmatprep.subr.mxu0 %v2966_v0  ;;  %2795 = vmatprep.subr.mxu1 %v2966_v0 }
0x1058   :  { %2787 = vmatpush3.msra.mxu0 %v3054_v7  ;;  %2796 = vmatpush3.msra.mxu1 %v3106_v28  ;;  %v185_v28 = vadd.f32 %v3077_v10, %v3212_v49 }
0x1059   :  { %2788 = vmatprep.subr.mxu0 %v2966_v0  ;;  %2797 = vmatprep.subr.mxu1 %v2966_v0 }
0x105a   :  { %2789 = vmatpush3.msra.mxu0 %v3062_v8  ;;  %2798 = vmatpush3.msra.mxu1 %v3123_v31 }
0x105b   :  { %2791 = vmatmul.mubr.msk.f32.vlgmr.msra.gmra.mxu0 %vm212_vm2, %v1689_v23  ;;  %2799 = vmatprep.subr.mxu1 %v2966_v0 }
0x105c   :  { %2804 = vmatprep.subr.mxu0 %v2966_v0  ;;  %2800 = vmatpush3.msra.mxu1 %v3135_v33 }
0x105d   :  { %2805 = vmatpush3.msra.mxu0 %v3088_v24  ;;  %2801 = vmatprep.mubr.msk.f32.mxu1 %vm2967_vm0, %v2966_v0 }
0x105e   :  { %2806 = vmatprep.subr.mxu0 %v2966_v0  ;;  %2815 = vmatprep.subr.mxu1 %v2966_v0 }
0x105f   :  { %2807 = vmatpush3.msra.mxu0 %v3111_v29  ;;  %2812 = vmatprep.mubr.msk.f32.mxu0 %vm2967_vm0, %v2966_v0 }
0x1060   :  { %2808 = vmatprep.subr.mxu0 %v2966_v0 }
0x1061   :  { %2809 = vmatpush3.msra.mxu0 %v3140_v34 }
0x1062   :  { %2810 = vmatprep.subr.mxu0 %v2966_v0 }
0x1063   :  { %2811 = vmatpush3.msra.mxu0 %v3161_v38 }
0x1064   :  { %2826 = vmatprep.subr.mxu0 %v2966_v0 }
0x1113   :  { %v1683_v2 = vpop.f32.mrf.mxu0 }
0x1114   :  { %v1758_v4 = vpop.f32.mrf.mxu1 }
0x1115   :  { %v1759_v7 = vadd.f32 %v1758_v4, %v1683_v2  ;;  %v2770_v8 = vpop.f32.mrf.mxu0 }
0x1116   :  { %v2781_v24 = vpop.f32.mrf.mxu1 }
0x1117   :  { %v1762_v26 = vadd.f32 %v3219_v51, %v1759_v7 }
0x1119   :  { %2910 = vtanh.f32 %v1762_v26 }
0x111b   :  { %v1849_v29 = vpop.f32.mrf.mxu0 }
0x111c   :  { %v1853_v31 = vadd.f32 %v1849_v29, %v185_v28 }
0x111d   :  { %v2792_v33 = vpop.f32.mrf.mxu0 }
0x111e   :  { %2912 = vtanh.f32 %v1853_v31 }
0x1126   :  { %v2911_v25 = vpop.eup %2910 }
0x1127   :  { %1768 = vrot.lane.b32.xlu0 %v2911_v25, %s2968_s11  ;;  %v1764_v30 = vadd.f32 1.0, %v2911_v25 }
0x1129   :  { %v1765_v32 = vmul.f32 0.5, %v1764_v30 }
0x112b   :  { %v2913_v27 = vpop.eup %2912  ;;  %v1766_v49 = vmul.f32 %v1765_v32, %v3435_v15 }
0x112c   :  { %1859 = vrot.lane.b32.xlu1 %v2913_v27, %s2968_s11  ;;  %v1855_v36 = vadd.f32 1.0, %v2913_v27 }
0x112e   :  { %v1856_v44 = vmul.f32 0.5, %v1855_v36 }
0x1130   :  { %v1857_v42 = vmul.f32 %v1856_v44, %v3437_v16 }
0x1199   :  { %v1769_v35 = vpop.permute.xlu0 %1768 }
0x119a   :  { %v1771_v37 = vmul.f32 %v1769_v35, %v1765_v32 }
0x119c   :  { %1773 = vrot.lane.b32.xlu0 %v1771_v37, %s2969_s12 }
0x119e   :  { %v1860_v39 = vpop.permute.xlu1 %1859 }
0x119f   :  { %v1862_v10 = vmul.f32 %v1860_v39, %v1856_v44 }
0x11a1   :  { %1864 = vrot.lane.b32.xlu1 %v1862_v10, %s2969_s12 }
0x120e   :  { %v1774_v40 = vpop.permute.xlu0 %1773 }
0x120f   :  { %v3486_v41 = vadd.f32 %v1774_v40, %v1766_v49 }
0x1211   :  { %2914 = vtanh.f32 %v3486_v41 }
0x1213   :  { %v1865_v43 = vpop.permute.xlu1 %1864 }
0x1214   :  { %v3490_v50 = vadd.f32 %v1865_v43, %v1857_v42 }
0x1216   :  { %2916 = vtanh.f32 %v3490_v50 }
0x121e   :  { %v2915_v52 = vpop.eup %2914 }
0x121f   :  { %1779 = vrot.lane.b32.xlu0 %v2915_v52, %s2968_s11 }
0x1223   :  { %v2917_v53 = vpop.eup %2916 }
0x1224   :  { %1870 = vrot.lane.b32.xlu1 %v2917_v53, %s2968_s11 }
0x1291   :  { %v1780_v54 = vpop.permute.xlu0 %1779 }
0x1292   :  { %v1782_v55 = vmul.f32 %v1780_v54, %v1765_v32 }
0x1294   :  { %1875 = vrot.lane.b32.xlu0 %v1782_v55, %s2969_s12 }
0x1296   :  { %v1871_v56 = vpop.permute.xlu1 %1870 }
0x1297   :  { %v1873_v57 = vmul.f32 %v1871_v56, %v1856_v44 }
0x1299   :  { %1950 = vrot.lane.b32.xlu1 %v1873_v57, %s2969_s12  ;;  %v2310_v57 = vld [vmem:[#allocation2 + $0x18] sm:$0xff] }
0x1306   :  { %v1876_v58 = vpop.permute.xlu0 %1875 }
0x1307   :  { %2802 = vmatmul.mubr.msk.f32.vlgmr.msra.gmra.mxu1 %vm212_vm2, %v1876_v58  ;;  %v2309_v58 = vld [vmem:[#allocation2 + $0x10] sm:$0xff] }
0x1308   :  { %2816 = vmatpush3.msra.mxu1 %v2930_v45  ;;  %2823 = vmatprep.mubr.msk.f32.mxu1 %vm2967_vm0, %v2966_v0  ;;  %v2307_v45 = vld [vmem:[#allocation2] sm:$0xff] }
0x1309   :  { %2817 = vmatprep.subr.mxu1 %v2966_v0 }
0x130a   :  { %2818 = vmatpush3.msra.mxu1 %v2931_v59 }
0x130b   :  { %2819 = vmatprep.subr.mxu1 %v2966_v0  ;;  %v1951_v60 = vpop.permute.xlu1 %1950 }
0x130c   :  { %2820 = vmatpush3.msra.mxu1 %v2932_v61  ;;  %2813 = vmatmul.mubr.msk.f32.vlgmr.msra.gmra.mxu0 %vm212_vm2, %v1951_v60 }
0x130d   :  { %2821 = vmatprep.subr.mxu1 %v2966_v0  ;;  %2827 = vmatpush3.msra.mxu0 %v2933_v62 }
0x130e   :  { %2822 = vmatpush3.msra.mxu1 %v2934_v63  ;;  %2828 = vmatprep.subr.mxu0 %v2966_v0  ;;  %v2431_v63 = vld [vmem:[%s3591_s8] ss:$0 sm:$0xff] }
0x130f   :  { %2824 = vmatmul.mubr.msk.f32.vlgmr.msra.gmra.mxu1 %vm212_vm2, %v1951_v60  ;;  %2837 = vmatprep.subr.mxu1 %v2966_v0 }
0x1310   :  { %2838 = vmatpush3.msra.mxu1 %v2935_v1  ;;  %2829 = vmatpush3.msra.mxu0 %v2936_v3 }
0x1311   :  { %2839 = vmatprep.subr.mxu1 %v2966_v0  ;;  %2830 = vmatprep.subr.mxu0 %v2966_v0 }
0x1312   :  { %2840 = vmatpush3.msra.mxu1 %v2937_v5  ;;  %2831 = vmatpush3.msra.mxu0 %v2938_v46 }
0x1313   :  { %2841 = vmatprep.subr.mxu1 %v2966_v0  ;;  %2832 = vmatprep.subr.mxu0 %v2966_v0 }
0x1314   :  { %2842 = vmatpush3.msra.mxu1 %v3140_v34  ;;  %2845 = vmatprep.mubr.msk.f32.mxu1 %vm2967_vm0, %v2966_v0 }
0x1315   :  { %2843 = vmatprep.subr.mxu1 %v2966_v0  ;;  %2833 = vmatpush3.msra.mxu0 %v2939_v6 }
0x1316   :  { %2844 = vmatpush3.msra.mxu1 %v3161_v38  ;;  %2834 = vmatprep.mubr.msk.f32.mxu0 %vm2967_vm0, %v2966_v0 }
0x1317   :  { %2848 = vmatprep.subr.mxu0 %v2966_v0 }
0x13c7   :  { %v1945_v9 = vpop.f32.mrf.mxu1 }
0x13c9   :  { %v2803_v11 = vpop.f32.mrf.mxu1 }
0x13cc   :  { %v2020_v34 = vpop.f32.mrf.mxu0 }
0x13cd   :  { %v2021_v12 = vadd.f32 %v2020_v34, %v1945_v9 }
0x13ce   :  { %v2814_v15 = vpop.f32.mrf.mxu0 }
0x13cf   :  { %v2024_v16 = vadd.f32 %v3219_v51, %v2021_v12  ;;  %v2111_v17 = vpop.f32.mrf.mxu1 }
0x13d0   :  { %v2115_v38 = vadd.f32 %v2111_v17, %v190_v14 }
0x13d1   :  { %2918 = vtanh.f32 %v2024_v16  ;;  %v2825_v18 = vpop.f32.mrf.mxu1 }
0x13d2   :  { %2920 = vtanh.f32 %v2115_v38 }
0x13de   :  { %v2919_v19 = vpop.eup %2918 }
0x13df   :  { %v2921_v20 = vpop.eup %2920  ;;  %2030 = vrot.lane.b32.xlu0 %v2919_v19, %s2968_s11  ;;  %v2026_v21 = vadd.f32 1.0, %v2919_v19 }
0x13e0   :  { %2121 = vrot.lane.b32.xlu1 %v2921_v20, %s2968_s11  ;;  %v2117_v22 = vadd.f32 1.0, %v2921_v20 }
0x13e1   :  { %v2027_v47 = vmul.f32 0.5, %v2026_v21 }
0x13e2   :  { %v2118_v23 = vmul.f32 0.5, %v2117_v22 }
0x13e3   :  { %v2028_v8 = vmul.f32 %v2027_v47, %v3486_v41 }
0x13e4   :  { %v2119_v24 = vmul.f32 %v2118_v23, %v3490_v50 }
0x1451   :  { %v2031_v2 = vpop.permute.xlu0 %2030 }
0x1452   :  { %v2122_v48 = vpop.permute.xlu1 %2121  ;;  %v2033_v4 = vmul.f32 %v2031_v2, %v2027_v47 }
0x1453   :  { %v2124_v7 = vmul.f32 %v2122_v48, %v2118_v23 }
0x1454   :  { %2035 = vrot.lane.b32.xlu0 %v2033_v4, %s2969_s12 }
0x1455   :  { %2126 = vrot.lane.b32.xlu1 %v2124_v7, %s2969_s12 }
0x14c6   :  { %v2036_v26 = vpop.permute.xlu0 %2035 }
0x14c7   :  { %v2127_v28 = vpop.permute.xlu1 %2126  ;;  %v2038_v29 = vadd.f32 %v2036_v26, %v2028_v8 }
0x14c8   :  { %v2129_v31 = vadd.f32 %v2127_v28, %v2119_v24 }
0x14c9   :  { %2922 = vtanh.f32 %v2038_v29 }
0x14ca   :  { %2924 = vtanh.f32 %v2129_v31 }
0x14d6   :  { %v2923_v33 = vpop.eup %2922 }
0x14d7   :  { %v2925_v25 = vpop.eup %2924  ;;  %2041 = vrot.lane.b32.xlu0 %v2923_v33, %s2968_s11 }
0x14d8   :  { %2132 = vrot.lane.b32.xlu1 %v2925_v25, %s2968_s11 }
0x1549   :  { %v2042_v27 = vpop.permute.xlu0 %2041 }
0x154a   :  { %v2133_v30 = vpop.permute.xlu1 %2132  ;;  %v2044_v32 = vmul.f32 %v2042_v27, %v2027_v47 }
0x154b   :  { %v2135_v35 = vmul.f32 %v2133_v30, %v2118_v23 }
0x154c   :  { %2137 = vrot.lane.b32.xlu0 %v2044_v32, %s2969_s12 }
0x154d   :  { %2212 = vrot.lane.b32.xlu1 %v2135_v35, %s2969_s12 }
0x15be   :  { %v2138_v36 = vpop.permute.xlu0 %2137 }
0x15bf   :  { %v2213_v37 = vpop.permute.xlu1 %2212  ;;  %2835 = vmatmul.mubr.msk.f32.vlgmr.msra.gmra.mxu0 %vm212_vm2, %v2138_v36 }
0x15c0   :  { %2846 = vmatmul.mubr.msk.f32.vlgmr.msra.gmra.mxu1 %vm212_vm2, %v2213_v37  ;;  %2856 = vmatprep.mubr.msk.f32.mxu0 %vm2967_vm0, %v2966_v0 }
0x15c1   :  { %2849 = vmatpush3.msra.mxu0 %v2310_v57 }
0x15c2   :  { %2850 = vmatprep.subr.mxu0 %v2966_v0 }
0x15c3   :  { %2851 = vmatpush3.msra.mxu0 %v2309_v58 }
0x15c4   :  { %2852 = vmatprep.subr.mxu0 %v2966_v0 }
0x167f   :  { %v2207_v44 = vpop.f32.mrf.mxu0 }
0x1680   :  { %v2282_v39 = vpop.f32.mrf.mxu1 }
0x1681   :  { %v2283_v10 = vadd.f32 %v2282_v39, %v2207_v44  ;;  %v2836_v49 = vpop.f32.mrf.mxu0 }
0x1682   :  { %v2847_v40 = vpop.f32.mrf.mxu1 }
0x1683   :  { %v2286_v41 = vadd.f32 %v3219_v51, %v2283_v10  ;;  %v2308_v51 = vld [vmem:[#allocation2 + $0x8] sm:$0xff] }
0x1684   :  { %2853 = vmatpush3.msra.mxu0 %v2308_v51 }
0x1685   :  { %2926 = vtanh.f32 %v2286_v41  ;;  %2854 = vmatprep.subr.mxu0 %v2966_v0 }
0x1686   :  { %2855 = vmatpush3.msra.mxu0 %v2307_v45 }
0x1692   :  { %v2927_v42 = vpop.eup %2926 }
0x1693   :  { %2292 = vrot.lane.b32.xlu0 %v2927_v42, %s2968_s11  ;;  %v2288_v43 = vadd.f32 1.0, %v2927_v42 }
0x1695   :  { %v2289_v50 = vmul.f32 0.5, %v2288_v43 }
0x1697   :  { %v2290_v54 = vmul.f32 %v2289_v50, %v2038_v29 }
0x1705   :  { %v2293_v52 = vpop.permute.xlu0 %2292 }
0x1706   :  { %v2295_v53 = vmul.f32 %v2293_v52, %v2289_v50 }
0x1708   :  { %2297 = vrot.lane.b32.xlu1 %v2295_v53, %s2969_s12 }
0x177a   :  { %v2298_v55 = vpop.permute.xlu1 %2297 }
0x177b   :  { %v2300_v56 = vadd.f32 %v2298_v55, %v2290_v54 }
0x177d   :  { %2928 = vtanh.f32 %v2300_v56 }
0x178a   :  { %v2929_v59 = vpop.eup %2928 }
0x178b   :  { %2303 = vrot.lane.b32.xlu0 %v2929_v59, %s2968_s11 }
0x17fd   :  { %v2304_v60 = vpop.permute.xlu0 %2303 }
0x17fe   :  { %v2306_v61 = vmul.f32 %v2304_v60, %v2289_v50 }
0x1800   :  { %2319 = vrot.lane.b32.xlu1 %v2306_v61, %s2969_s12 }
0x1872   :  { %v2320_v62 = vpop.permute.xlu1 %2319 }
0x1873   :  { %2857 = vmatmul.mubr.msk.f32.vlgmr.msra.gmra.mxu0 %vm212_vm2, %v2320_v62 }
0x1933   :  { %v2389_v1 = vpop.f32.mrf.mxu0 }
0x1934   :  { %v2390_v3 = vadd.f32 %v2431_v63, %v2389_v1 }
0x1935   :  { %v2858_v5 = vpop.f32.mrf.mxu0 }
0x1936   :  { %2393 = vst [vmem:[%s3592_s9] sm:$0xff] %v2390_v3 }
0x1937   :  { %2398 = vsyncpa [#allocation3], 1 }

</bundles_post_ra>
